<compile_context>
chip_gen: v7x
topology: tpu7x:2x2x1
jax: 0.10.0
libtpu: 0.0.40
codegen_flags: <defaults>
</compile_context>

<pallas_src>
import functools

import jax
import jax.numpy as jnp
from jax import lax
from jax.experimental import pallas as pl
from jax.experimental.pallas import tpu as pltpu

CHANNEL = 18
IN_C = CHANNEL - 5              # 13
H2 = 128                        # per-branch width after layer 2
LOCAL_C = 128
GLOBAL_C = 512
OUT_DIM = 12 * LOCAL_C + GLOBAL_C   # 2048

# TB*num (point-rows) processed per grid step.  ~2K rows keeps peak f32
# activations (~5 KB/row) + double-buffered in/out blocks well under the
# default scoped-VMEM limit on every generation incl. v7x's 64 MiB.
_MAX_ROWS_PER_STEP = 2048


def encoder_kernel(x_ref, w1, b1, w2, b2, w3l, b3l, w3g, b3g, out_ref, *, num_valid):
    # x_ref : (TB, NP, 18) f32  -- points-major slab, [13 features | 5 mask] on lanes
    # out   : (TB, 2048)   f32
    tb, npts, _ = x_ref.shape
    blk = x_ref[...]                               # read block once
    feats = blk[:, :, :IN_C]                       # (TB, NP, 13)
    mask = blk[:, :, IN_C:]                        # (TB, NP, 5)

    cdt = w1.dtype                                 # bf16 (or f32) MXU input dtype
    x = feats.reshape(tb * npts, IN_C).astype(cdt)

    # Fused local+global MLP: 13 -> [64|64] -> ReLU -> [128|128] -> ReLU -> 128 / 512.
    h = jnp.dot(x, w1[...], preferred_element_type=jnp.float32) + b1[...]
    h = jnp.maximum(h, 0.0).astype(cdt)
    h = jnp.dot(h, w2[...], preferred_element_type=jnp.float32) + b2[...]
    h = jnp.maximum(h, 0.0).astype(cdt)            # (M, 256) = [local 128 | global 128]
    # Layer 3 split (no zero-padded block-diagonal weight).
    lx = jnp.dot(h[:, :H2], w3l[...], preferred_element_type=jnp.float32) + b3l[...]
    gx = jnp.dot(h[:, H2:], w3g[...], preferred_element_type=jnp.float32) + b3g[...]

    lx = lx.reshape(tb, npts, LOCAL_C)             # (TB, NP, 128)
    gx = gx.reshape(tb, npts, GLOBAL_C)            # (TB, NP, 512)

    padded = npts != num_valid                     # static: point axis was padded to %8
    if padded:
        valid = lax.broadcasted_iota(jnp.int32, (tb, npts, 1), 1) < num_valid
        ninf = jnp.float32(-jnp.inf)
        pinf = jnp.float32(jnp.inf)
        gx = jnp.where(valid, gx, ninf)
        fill_max = jnp.where(valid, jnp.float32(0.0), ninf)
        fill_min = jnp.where(valid, jnp.float32(0.0), pinf)

    # Global branch: plain max-pool over the point (sublane) axis -> last 512 lanes.
    out_ref[:, 12 * LOCAL_C:] = jnp.max(gx, axis=1)

    # Masked max/min pooling of the local branch (masks sliced once from the
    # register-resident block; each select reused for max and min when no
    # point padding is present).
    m0 = jnp.sum(mask, axis=2, keepdims=True) < 0.9          # (TB, NP, 1)
    if padded:
        m0 = jnp.logical_and(m0, valid)
    for k in range(6):
        mk = m0 if k == 0 else (mask[:, :, k - 1:k] != 0.0)
        if padded:
            mx = jnp.max(jnp.where(mk, lx, fill_max), axis=1)
            mn = jnp.min(jnp.where(mk, lx, fill_min), axis=1)
        else:
            sel = jnp.where(mk, lx, 0.0)                     # computed once, reused
            mx = jnp.max(sel, axis=1)
            mn = jnp.min(sel, axis=1)
        out_ref[:, k * LOCAL_C:(k + 1) * LOCAL_C] = mx
        out_ref[:, (6 + k) * LOCAL_C:(7 + k) * LOCAL_C] = mn


def _fuse_params(params, matmul_dtype):
    """layer1 concat (13,128); layer2 block-diag (128,256); layer3 kept split."""
    lw1, lb1, lw2, lb2, lw3, lb3 = params["local"]
    gw1, gb1, gw2, gb2, gw3, gb3 = params["global"]

    w1 = jnp.concatenate([lw1, gw1], axis=1).astype(matmul_dtype)       # (13, 128)
    b1 = jnp.concatenate([lb1, gb1], axis=1)                            # (1, 128) f32

    z = jnp.zeros((64, 128), jnp.float32)
    w2 = jnp.concatenate([jnp.concatenate([lw2, z], axis=1),
                          jnp.concatenate([z, gw2], axis=1)],
                         axis=0).astype(matmul_dtype)                    # (128, 256)
    b2 = jnp.concatenate([lb2, gb2], axis=1)                            # (1, 256) f32

    w3l = lw3.astype(matmul_dtype)                                       # (128, 128)
    w3g = gw3.astype(matmul_dtype)                                       # (128, 512)
    return w1, b1, w2, b2, w3l, lb3, w3g, gb3


def _pick_tb(batch, npts, max_rows):
    """Batch elements per grid step: VMEM-capped, multiple of 8 (or == batch)."""
    cap = max(8, (max_rows // max(npts, 1)) // 8 * 8)
    if batch < 16:
        return max(1, min(batch, cap))          # tiny batch: block == full batch dim
    # Keep >=2 (ideally >=4) grid steps so "parallel" can use both v7x TensorCores.
    steps = 4 if batch >= 32 else 2
    tb = min(cap, ((-(-batch // steps)) + 7) // 8 * 8)
    return max(8, tb)


def encoder_forward(points, params, *, matmul_dtype=jnp.bfloat16,
                    max_rows_per_step=_MAX_ROWS_PER_STEP):
    """points: (B, CHANNEL * num) f32  ->  (B, 2048) f32"""
    B = points.shape[0]
    num = points.shape[1] // CHANNEL
    p = points.reshape(B, CHANNEL, num)            # free view (torch NCW semantics)
    pts = jnp.transpose(p, (0, 2, 1))              # (B, num, 18), single host transpose
    # TODO(synk): fold this transpose into the kernel (minor-dim transpose of the
    # (TB, 18, num) slab on the idle XLU) to drop this extra HBM pass entirely.

    npad = -(-num // 8) * 8                        # point axis multiple of 8
    if npad != num:
        pts = jnp.pad(pts, ((0, 0), (0, npad - num), (0, 0)))

    weights = _fuse_params(params, matmul_dtype)
    tb = _pick_tb(B, npad, max_rows_per_step)
    grid = (pl.cdiv(B, tb),)                       # ragged batch -> masked edge block

    flops = 2 * B * num * (IN_C * 128 + 128 * 256 + 128 * LOCAL_C + 128 * GLOBAL_C)
    bytes_accessed = (int(pts.size) * pts.dtype.itemsize
                      + B * OUT_DIM * 4
                      + sum(int(w.size) * w.dtype.itemsize for w in weights))

    kern = functools.partial(encoder_kernel, num_valid=num)
    out = pl.pallas_call(
        kern,
        out_shape=jax.ShapeDtypeStruct((B, OUT_DIM), jnp.float32),
        grid_spec=pltpu.PrefetchScalarGridSpec(
            num_scalar_prefetch=0,
            grid=grid,
            in_specs=[pl.BlockSpec((tb, npad, CHANNEL), lambda b: (b, 0, 0))]
                     # constant index_map -> weights DMA'd once, never re-fetched
                     + [pl.BlockSpec(w.shape, lambda b: (0, 0)) for w in weights],
            out_specs=pl.BlockSpec((tb, OUT_DIM), lambda b: (b, 0)),
        ),
        compiler_params=pltpu.CompilerParams(dimension_semantics=("parallel",)),
        cost_estimate=pl.CostEstimate(flops=flops, transcendentals=0,
                                      bytes_accessed=bytes_accessed),
    )(pts, *weights)
    # TODO(synk): for very large point counts add an inner N-tile reduction axis
    # (running max/min VMEM accumulators via pltpu.emit_pipeline) so TB stays
    # large without exceeding v7x's 64 MiB VMEM.
    return out


def init_params(key):
    """Deterministic synthetic weights. Conv1d(k=1) weight (Cout,Cin,1) is stored
    transposed as (Cin, Cout) so the kernel can do x @ W. Biases kept as (1, Cout)."""
    def layer(k, cin, cout):
        kw, kb = jax.random.split(k)
        w = jax.random.normal(kw, (cin, cout), jnp.float32) * 0.1
        b = jax.random.normal(kb, (1, cout), jnp.float32) * 0.05
        return w, b

    ks = jax.random.split(key, 6)
    lw1, lb1 = layer(ks[0], IN_C, 64)
    lw2, lb2 = layer(ks[1], 64, 128)
    lw3, lb3 = layer(ks[2], 128, LOCAL_C)
    gw1, gb1 = layer(ks[3], IN_C, 64)
    gw2, gb2 = layer(ks[4], 64, 128)
    gw3, gb3 = layer(ks[5], 128, GLOBAL_C)
    return {"local": (lw1, lb1, lw2, lb2, lw3, lb3),
            "global": (gw1, gb1, gw2, gb2, gw3, gb3)}


def encoder_ref(points, params):
    """Pure-JAX f32 reference mirroring the PyTorch forward exactly."""
    B = points.shape[0]
    num = points.shape[1] // CHANNEL
    p = points.reshape(B, CHANNEL, num)
    x = jnp.transpose(p[:, :IN_C, :], (0, 2, 1))       # (B, N, 13)
    mask = jnp.transpose(p[:, IN_C:, :], (0, 2, 1))    # (B, N, 5)

    def mlp(xin, w1, b1, w2, b2, w3, b3):
        h = jax.nn.relu(xin @ w1 + b1)
        h = jax.nn.relu(h @ w2 + b2)
        return h @ w3 + b3

    lx = mlp(x, *params["local"])                      # (B, N, 128)
    gx = jnp.max(mlp(x, *params["global"]), axis=1)    # (B, 512)

    m0 = jnp.sum(mask, axis=2, keepdims=True) < 0.9
    masks = [m0] + [(mask[:, :, k:k + 1] != 0.0) for k in range(5)]
    parts = [jnp.max(jnp.where(mk, lx, 0.0), axis=1) for mk in masks]
    parts += [jnp.min(jnp.where(mk, lx, 0.0), axis=1) for mk in masks]
    parts.append(gx)
    return jnp.concatenate(parts, axis=-1)


if __name__ == "__main__":
    key = jax.random.PRNGKey(0)
    k_feat, k_mask, k_params = jax.random.split(key, 3)

    B, num = 2, 16
    feats = jax.random.normal(k_feat, (B, IN_C, num), jnp.float32)
    mask_ch = jax.random.bernoulli(k_mask, 0.5, (B, 5, num)).astype(jnp.float32)
    points = jnp.concatenate([feats, mask_ch], axis=1).reshape(B, CHANNEL * num)

    params = init_params(k_params)

    out = jax.block_until_ready(encoder_forward(points, params))
    ref = jax.block_until_ready(encoder_ref(points, params))

    assert out.shape == (B, OUT_DIM), out.shape
    # bf16 MXU inputs (f32 accumulation) -> tolerance loosened vs. pure-f32 reference.
    assert jnp.allclose(out, ref, rtol=2e-2, atol=2e-2), float(jnp.max(jnp.abs(out - ref)))
    print("KERNEL_OK")
</pallas_src>

<mosaic_0001>
module attributes {stable_mosaic.version = 11 : i64} {
  func.func @encoder_kernel(%arg0: i32, %arg1: memref<2x16x18xf32, #tpu.memory_space<vmem>>, %arg2: memref<13x128xbf16, #tpu.memory_space<vmem>>, %arg3: memref<1x128xf32, #tpu.memory_space<vmem>>, %arg4: memref<128x256xbf16, #tpu.memory_space<vmem>>, %arg5: memref<1x256xf32, #tpu.memory_space<vmem>>, %arg6: memref<128x128xbf16, #tpu.memory_space<vmem>>, %arg7: memref<1x128xf32, #tpu.memory_space<vmem>>, %arg8: memref<128x512xbf16, #tpu.memory_space<vmem>>, %arg9: memref<1x512xf32, #tpu.memory_space<vmem>>, %arg10: memref<2x2048xf32, #tpu.memory_space<vmem>>) attributes {dimension_semantics = [#tpu.dimension_semantics<parallel>], iteration_bounds = array<i64: 1>, scalar_prefetch = 0 : i64, scratch_operands = 0 : i64, tpu.core_type = #tpu.core_type<tc>, window_params = [{transform_indices = @transform_0, window_bounds = array<i64: 2, 16, 18>}, {pipeline_mode = #tpu.pipeline_mode<synchronous>, transform_indices = @transform_1, window_bounds = array<i64: 13, 128>}, {pipeline_mode = #tpu.pipeline_mode<synchronous>, transform_indices = @transform_2, window_bounds = array<i64: 1, 128>}, {pipeline_mode = #tpu.pipeline_mode<synchronous>, transform_indices = @transform_3, window_bounds = array<i64: 128, 256>}, {pipeline_mode = #tpu.pipeline_mode<synchronous>, transform_indices = @transform_4, window_bounds = array<i64: 1, 256>}, {pipeline_mode = #tpu.pipeline_mode<synchronous>, transform_indices = @transform_5, window_bounds = array<i64: 128, 128>}, {pipeline_mode = #tpu.pipeline_mode<synchronous>, transform_indices = @transform_6, window_bounds = array<i64: 1, 128>}, {pipeline_mode = #tpu.pipeline_mode<synchronous>, transform_indices = @transform_7, window_bounds = array<i64: 128, 512>}, {pipeline_mode = #tpu.pipeline_mode<synchronous>, transform_indices = @transform_8, window_bounds = array<i64: 1, 512>}, {transform_indices = @transform_9, window_bounds = array<i64: 2, 2048>}]} {
    %c0 = arith.constant 0 : index
    %c0_0 = arith.constant 0 : index
    %c0_1 = arith.constant 0 : index
    %0 = vector.load %arg1[%c0, %c0_0, %c0_1] : memref<2x16x18xf32, #tpu.memory_space<vmem>>, vector<2x16x18xf32>
    %1 = vector.extract_strided_slice %0 {offsets = [0, 0, 0], sizes = [2, 16, 13], strides = [1, 1, 1]} : vector<2x16x18xf32> to vector<2x16x13xf32>
    %2 = vector.extract_strided_slice %0 {offsets = [0, 0, 13], sizes = [2, 16, 5], strides = [1, 1, 1]} : vector<2x16x18xf32> to vector<2x16x5xf32>
    %3 = vector.shape_cast %1 : vector<2x16x13xf32> to vector<32x13xf32>
    %4 = arith.truncf %3 : vector<32x13xf32> to vector<32x13xbf16>
    %c0_2 = arith.constant 0 : index
    %c0_3 = arith.constant 0 : index
    %5 = vector.load %arg2[%c0_2, %c0_3] : memref<13x128xbf16, #tpu.memory_space<vmem>>, vector<13x128xbf16>
    %cst = arith.constant dense<0.000000e+00> : vector<32x128xf32>
    %6 = tpu.matmul %4, %5, %cst {dimension_numbers = #tpu.dot_dimension_numbers<[1], [0], [0], [1], [0, 0, 1, 1], [], []>} : vector<32x13xbf16>, vector<13x128xbf16>, vector<32x128xf32> -> vector<32x128xf32>
    %c0_4 = arith.constant 0 : index
    %c0_5 = arith.constant 0 : index
    %7 = vector.load %arg3[%c0_4, %c0_5] : memref<1x128xf32, #tpu.memory_space<vmem>>, vector<1x128xf32>
    %8 = vector.broadcast %7 : vector<1x128xf32> to vector<32x128xf32>
    %9 = arith.addf %6, %8 : vector<32x128xf32>
    %cst_6 = arith.constant 0.000000e+00 : f32
    %10 = vector.broadcast %cst_6 : f32 to vector<32x128xf32>
    %11 = arith.maximumf %9, %10 : vector<32x128xf32>
    %12 = arith.truncf %11 : vector<32x128xf32> to vector<32x128xbf16>
    %c0_7 = arith.constant 0 : index
    %c0_8 = arith.constant 0 : index
    %13 = vector.load %arg4[%c0_7, %c0_8] : memref<128x256xbf16, #tpu.memory_space<vmem>>, vector<128x256xbf16>
    %cst_9 = arith.constant dense<0.000000e+00> : vector<32x256xf32>
    %14 = tpu.matmul %12, %13, %cst_9 {dimension_numbers = #tpu.dot_dimension_numbers<[1], [0], [0], [1], [0, 0, 1, 1], [], []>} : vector<32x128xbf16>, vector<128x256xbf16>, vector<32x256xf32> -> vector<32x256xf32>
    %c0_10 = arith.constant 0 : index
    %c0_11 = arith.constant 0 : index
    %15 = vector.load %arg5[%c0_10, %c0_11] : memref<1x256xf32, #tpu.memory_space<vmem>>, vector<1x256xf32>
    %16 = vector.broadcast %15 : vector<1x256xf32> to vector<32x256xf32>
    %17 = arith.addf %14, %16 : vector<32x256xf32>
    %cst_12 = arith.constant 0.000000e+00 : f32
    %18 = vector.broadcast %cst_12 : f32 to vector<32x256xf32>
    %19 = arith.maximumf %17, %18 : vector<32x256xf32>
    %20 = arith.truncf %19 : vector<32x256xf32> to vector<32x256xbf16>
    %21 = vector.extract_strided_slice %20 {offsets = [0, 0], sizes = [32, 128], strides = [1, 1]} : vector<32x256xbf16> to vector<32x128xbf16>
    %c0_13 = arith.constant 0 : index
    %c0_14 = arith.constant 0 : index
    %22 = vector.load %arg6[%c0_13, %c0_14] : memref<128x128xbf16, #tpu.memory_space<vmem>>, vector<128x128xbf16>
    %cst_15 = arith.constant dense<0.000000e+00> : vector<32x128xf32>
    %23 = tpu.matmul %21, %22, %cst_15 {dimension_numbers = #tpu.dot_dimension_numbers<[1], [0], [0], [1], [0, 0, 1, 1], [], []>} : vector<32x128xbf16>, vector<128x128xbf16>, vector<32x128xf32> -> vector<32x128xf32>
    %c0_16 = arith.constant 0 : index
    %c0_17 = arith.constant 0 : index
    %24 = vector.load %arg7[%c0_16, %c0_17] : memref<1x128xf32, #tpu.memory_space<vmem>>, vector<1x128xf32>
    %25 = vector.broadcast %24 : vector<1x128xf32> to vector<32x128xf32>
    %26 = arith.addf %23, %25 : vector<32x128xf32>
    %27 = vector.extract_strided_slice %20 {offsets = [0, 128], sizes = [32, 128], strides = [1, 1]} : vector<32x256xbf16> to vector<32x128xbf16>
    %c0_18 = arith.constant 0 : index
    %c0_19 = arith.constant 0 : index
    %28 = vector.load %arg8[%c0_18, %c0_19] : memref<128x512xbf16, #tpu.memory_space<vmem>>, vector<128x512xbf16>
    %cst_20 = arith.constant dense<0.000000e+00> : vector<32x512xf32>
    %29 = tpu.matmul %27, %28, %cst_20 {dimension_numbers = #tpu.dot_dimension_numbers<[1], [0], [0], [1], [0, 0, 1, 1], [], []>} : vector<32x128xbf16>, vector<128x512xbf16>, vector<32x512xf32> -> vector<32x512xf32>
    %c0_21 = arith.constant 0 : index
    %c0_22 = arith.constant 0 : index
    %30 = vector.load %arg9[%c0_21, %c0_22] : memref<1x512xf32, #tpu.memory_space<vmem>>, vector<1x512xf32>
    %31 = vector.broadcast %30 : vector<1x512xf32> to vector<32x512xf32>
    %32 = arith.addf %29, %31 : vector<32x512xf32>
    %33 = vector.shape_cast %26 : vector<32x128xf32> to vector<2x16x128xf32>
    %34 = vector.shape_cast %32 : vector<32x512xf32> to vector<2x16x512xf32>
    %cst_23 = arith.constant dense<0xFF800000> : vector<2x512xf32>
    %35 = vector.multi_reduction <maximumf>, %34, %cst_23 [1] : vector<2x16x512xf32> to vector<2x512xf32>
    %c0_24 = arith.constant 0 : index
    %c1536 = arith.constant 1536 : index
    %36 = vector.load %arg10[%c0_24, %c1536] : memref<2x2048xf32, #tpu.memory_space<vmem>>, vector<2x512xf32>
    tpu.vector_store %arg10[%c0_24, %c1536], %35 {strides = array<i32>} : memref<2x2048xf32, #tpu.memory_space<vmem>>, vector<2x512xf32>,
    %cst_25 = arith.constant dense<0.000000e+00> : vector<2x16xf32>
    %37 = vector.multi_reduction <add>, %2, %cst_25 [2] : vector<2x16x5xf32> to vector<2x16xf32>
    %38 = vector.shape_cast %37 : vector<2x16xf32> to vector<2x16x1xf32>
    %cst_26 = arith.constant 0.899999976 : f32
    %39 = vector.broadcast %cst_26 : f32 to vector<2x16x1xf32>
    %40 = arith.cmpf olt, %38, %39 : vector<2x16x1xf32>
    %cst_27 = arith.constant 0.000000e+00 : f32
    %41 = vector.shape_cast %40 : vector<2x16x1xi1> to vector<2x16x1xi1>
    %42 = vector.broadcast %41 : vector<2x16x1xi1> to vector<2x16x128xi1>
    %43 = vector.broadcast %cst_27 : f32 to vector<2x16x128xf32>
    %44 = arith.select %42, %33, %43 : vector<2x16x128xi1>, vector<2x16x128xf32>
    %cst_28 = arith.constant dense<0xFF800000> : vector<2x128xf32>
    %45 = vector.multi_reduction <maximumf>, %44, %cst_28 [1] : vector<2x16x128xf32> to vector<2x128xf32>
    %cst_29 = arith.constant dense<0x7F800000> : vector<2x128xf32>
    %46 = vector.multi_reduction <minimumf>, %44, %cst_29 [1] : vector<2x16x128xf32> to vector<2x128xf32>
    %c0_30 = arith.constant 0 : index
    %c0_31 = arith.constant 0 : index
    %47 = vector.load %arg10[%c0_30, %c0_31] : memref<2x2048xf32, #tpu.memory_space<vmem>>, vector<2x128xf32>
    tpu.vector_store %arg10[%c0_30, %c0_31], %45 {strides = array<i32>} : memref<2x2048xf32, #tpu.memory_space<vmem>>, vector<2x128xf32>,
    %c0_32 = arith.constant 0 : index
    %c768 = arith.constant 768 : index
    %48 = vector.load %arg10[%c0_32, %c768] : memref<2x2048xf32, #tpu.memory_space<vmem>>, vector<2x128xf32>
    tpu.vector_store %arg10[%c0_32, %c768], %46 {strides = array<i32>} : memref<2x2048xf32, #tpu.memory_space<vmem>>, vector<2x128xf32>,
    %49 = vector.extract_strided_slice %2 {offsets = [0, 0, 0], sizes = [2, 16, 1], strides = [1, 1, 1]} : vector<2x16x5xf32> to vector<2x16x1xf32>
    %cst_33 = arith.constant 0.000000e+00 : f32
    %50 = vector.broadcast %cst_33 : f32 to vector<2x16x1xf32>
    %51 = arith.cmpf one, %49, %50 : vector<2x16x1xf32>
    %cst_34 = arith.constant 0.000000e+00 : f32
    %52 = vector.shape_cast %51 : vector<2x16x1xi1> to vector<2x16x1xi1>
    %53 = vector.broadcast %52 : vector<2x16x1xi1> to vector<2x16x128xi1>
    %54 = vector.broadcast %cst_34 : f32 to vector<2x16x128xf32>
    %55 = arith.select %53, %33, %54 : vector<2x16x128xi1>, vector<2x16x128xf32>
    %cst_35 = arith.constant dense<0xFF800000> : vector<2x128xf32>
    %56 = vector.multi_reduction <maximumf>, %55, %cst_35 [1] : vector<2x16x128xf32> to vector<2x128xf32>
    %cst_36 = arith.constant dense<0x7F800000> : vector<2x128xf32>
    %57 = vector.multi_reduction <minimumf>, %55, %cst_36 [1] : vector<2x16x128xf32> to vector<2x128xf32>
    %c0_37 = arith.constant 0 : index
    %c128 = arith.constant 128 : index
    %58 = vector.load %arg10[%c0_37, %c128] : memref<2x2048xf32, #tpu.memory_space<vmem>>, vector<2x128xf32>
    tpu.vector_store %arg10[%c0_37, %c128], %56 {strides = array<i32>} : memref<2x2048xf32, #tpu.memory_space<vmem>>, vector<2x128xf32>,
    %c0_38 = arith.constant 0 : index
    %c896 = arith.constant 896 : index
    %59 = vector.load %arg10[%c0_38, %c896] : memref<2x2048xf32, #tpu.memory_space<vmem>>, vector<2x128xf32>
    tpu.vector_store %arg10[%c0_38, %c896], %57 {strides = array<i32>} : memref<2x2048xf32, #tpu.memory_space<vmem>>, vector<2x128xf32>,
    %60 = vector.extract_strided_slice %2 {offsets = [0, 0, 1], sizes = [2, 16, 1], strides = [1, 1, 1]} : vector<2x16x5xf32> to vector<2x16x1xf32>
    %cst_39 = arith.constant 0.000000e+00 : f32
    %61 = vector.broadcast %cst_39 : f32 to vector<2x16x1xf32>
    %62 = arith.cmpf one, %60, %61 : vector<2x16x1xf32>
    %cst_40 = arith.constant 0.000000e+00 : f32
    %63 = vector.shape_cast %62 : vector<2x16x1xi1> to vector<2x16x1xi1>
    %64 = vector.broadcast %63 : vector<2x16x1xi1> to vector<2x16x128xi1>
    %65 = vector.broadcast %cst_40 : f32 to vector<2x16x128xf32>
    %66 = arith.select %64, %33, %65 : vector<2x16x128xi1>, vector<2x16x128xf32>
    %cst_41 = arith.constant dense<0xFF800000> : vector<2x128xf32>
    %67 = vector.multi_reduction <maximumf>, %66, %cst_41 [1] : vector<2x16x128xf32> to vector<2x128xf32>
    %cst_42 = arith.constant dense<0x7F800000> : vector<2x128xf32>
    %68 = vector.multi_reduction <minimumf>, %66, %cst_42 [1] : vector<2x16x128xf32> to vector<2x128xf32>
    %c0_43 = arith.constant 0 : index
    %c256 = arith.constant 256 : index
    %69 = vector.load %arg10[%c0_43, %c256] : memref<2x2048xf32, #tpu.memory_space<vmem>>, vector<2x128xf32>
    tpu.vector_store %arg10[%c0_43, %c256], %67 {strides = array<i32>} : memref<2x2048xf32, #tpu.memory_space<vmem>>, vector<2x128xf32>,
    %c0_44 = arith.constant 0 : index
    %c1024 = arith.constant 1024 : index
    %70 = vector.load %arg10[%c0_44, %c1024] : memref<2x2048xf32, #tpu.memory_space<vmem>>, vector<2x128xf32>
    tpu.vector_store %arg10[%c0_44, %c1024], %68 {strides = array<i32>} : memref<2x2048xf32, #tpu.memory_space<vmem>>, vector<2x128xf32>,
    %71 = vector.extract_strided_slice %2 {offsets = [0, 0, 2], sizes = [2, 16, 1], strides = [1, 1, 1]} : vector<2x16x5xf32> to vector<2x16x1xf32>
    %cst_45 = arith.constant 0.000000e+00 : f32
    %72 = vector.broadcast %cst_45 : f32 to vector<2x16x1xf32>
    %73 = arith.cmpf one, %71, %72 : vector<2x16x1xf32>
    %cst_46 = arith.constant 0.000000e+00 : f32
    %74 = vector.shape_cast %73 : vector<2x16x1xi1> to vector<2x16x1xi1>
    %75 = vector.broadcast %74 : vector<2x16x1xi1> to vector<2x16x128xi1>
    %76 = vector.broadcast %cst_46 : f32 to vector<2x16x128xf32>
    %77 = arith.select %75, %33, %76 : vector<2x16x128xi1>, vector<2x16x128xf32>
    %cst_47 = arith.constant dense<0xFF800000> : vector<2x128xf32>
    %78 = vector.multi_reduction <maximumf>, %77, %cst_47 [1] : vector<2x16x128xf32> to vector<2x128xf32>
    %cst_48 = arith.constant dense<0x7F800000> : vector<2x128xf32>
    %79 = vector.multi_reduction <minimumf>, %77, %cst_48 [1] : vector<2x16x128xf32> to vector<2x128xf32>
    %c0_49 = arith.constant 0 : index
    %c384 = arith.constant 384 : index
    %80 = vector.load %arg10[%c0_49, %c384] : memref<2x2048xf32, #tpu.memory_space<vmem>>, vector<2x128xf32>
    tpu.vector_store %arg10[%c0_49, %c384], %78 {strides = array<i32>} : memref<2x2048xf32, #tpu.memory_space<vmem>>, vector<2x128xf32>,
    %c0_50 = arith.constant 0 : index
    %c1152 = arith.constant 1152 : index
    %81 = vector.load %arg10[%c0_50, %c1152] : memref<2x2048xf32, #tpu.memory_space<vmem>>, vector<2x128xf32>
    tpu.vector_store %arg10[%c0_50, %c1152], %79 {strides = array<i32>} : memref<2x2048xf32, #tpu.memory_space<vmem>>, vector<2x128xf32>,
    %82 = vector.extract_strided_slice %2 {offsets = [0, 0, 3], sizes = [2, 16, 1], strides = [1, 1, 1]} : vector<2x16x5xf32> to vector<2x16x1xf32>
    %cst_51 = arith.constant 0.000000e+00 : f32
    %83 = vector.broadcast %cst_51 : f32 to vector<2x16x1xf32>
    %84 = arith.cmpf one, %82, %83 : vector<2x16x1xf32>
    %cst_52 = arith.constant 0.000000e+00 : f32
    %85 = vector.shape_cast %84 : vector<2x16x1xi1> to vector<2x16x1xi1>
    %86 = vector.broadcast %85 : vector<2x16x1xi1> to vector<2x16x128xi1>
    %87 = vector.broadcast %cst_52 : f32 to vector<2x16x128xf32>
    %88 = arith.select %86, %33, %87 : vector<2x16x128xi1>, vector<2x16x128xf32>
    %cst_53 = arith.constant dense<0xFF800000> : vector<2x128xf32>
    %89 = vector.multi_reduction <maximumf>, %88, %cst_53 [1] : vector<2x16x128xf32> to vector<2x128xf32>
    %cst_54 = arith.constant dense<0x7F800000> : vector<2x128xf32>
    %90 = vector.multi_reduction <minimumf>, %88, %cst_54 [1] : vector<2x16x128xf32> to vector<2x128xf32>
    %c0_55 = arith.constant 0 : index
    %c512 = arith.constant 512 : index
    %91 = vector.load %arg10[%c0_55, %c512] : memref<2x2048xf32, #tpu.memory_space<vmem>>, vector<2x128xf32>
    tpu.vector_store %arg10[%c0_55, %c512], %89 {strides = array<i32>} : memref<2x2048xf32, #tpu.memory_space<vmem>>, vector<2x128xf32>,
    %c0_56 = arith.constant 0 : index
    %c1280 = arith.constant 1280 : index
    %92 = vector.load %arg10[%c0_56, %c1280] : memref<2x2048xf32, #tpu.memory_space<vmem>>, vector<2x128xf32>
    tpu.vector_store %arg10[%c0_56, %c1280], %90 {strides = array<i32>} : memref<2x2048xf32, #tpu.memory_space<vmem>>, vector<2x128xf32>,
    %93 = vector.extract_strided_slice %2 {offsets = [0, 0, 4], sizes = [2, 16, 1], strides = [1, 1, 1]} : vector<2x16x5xf32> to vector<2x16x1xf32>
    %cst_57 = arith.constant 0.000000e+00 : f32
    %94 = vector.broadcast %cst_57 : f32 to vector<2x16x1xf32>
    %95 = arith.cmpf one, %93, %94 : vector<2x16x1xf32>
    %cst_58 = arith.constant 0.000000e+00 : f32
    %96 = vector.shape_cast %95 : vector<2x16x1xi1> to vector<2x16x1xi1>
    %97 = vector.broadcast %96 : vector<2x16x1xi1> to vector<2x16x128xi1>
    %98 = vector.broadcast %cst_58 : f32 to vector<2x16x128xf32>
    %99 = arith.select %97, %33, %98 : vector<2x16x128xi1>, vector<2x16x128xf32>
    %cst_59 = arith.constant dense<0xFF800000> : vector<2x128xf32>
    %100 = vector.multi_reduction <maximumf>, %99, %cst_59 [1] : vector<2x16x128xf32> to vector<2x128xf32>
    %cst_60 = arith.constant dense<0x7F800000> : vector<2x128xf32>
    %101 = vector.multi_reduction <minimumf>, %99, %cst_60 [1] : vector<2x16x128xf32> to vector<2x128xf32>
    %c0_61 = arith.constant 0 : index
    %c640 = arith.constant 640 : index
    %102 = vector.load %arg10[%c0_61, %c640] : memref<2x2048xf32, #tpu.memory_space<vmem>>, vector<2x128xf32>
    tpu.vector_store %arg10[%c0_61, %c640], %100 {strides = array<i32>} : memref<2x2048xf32, #tpu.memory_space<vmem>>, vector<2x128xf32>,
    %c0_62 = arith.constant 0 : index
    %c1408 = arith.constant 1408 : index
    %103 = vector.load %arg10[%c0_62, %c1408] : memref<2x2048xf32, #tpu.memory_space<vmem>>, vector<2x128xf32>
    tpu.vector_store %arg10[%c0_62, %c1408], %101 {strides = array<i32>} : memref<2x2048xf32, #tpu.memory_space<vmem>>, vector<2x128xf32>,
    return
  }
  func.func @transform_0(%arg0: i32) -> (i32, i32, i32) {
    %c0_i32 = arith.constant 0 : i32
    %c0_i32_0 = arith.constant 0 : i32
    %c0_i32_1 = arith.constant 0 : i32
    return %arg0, %c0_i32, %c0_i32_0 : i32, i32, i32
  }
  func.func @transform_1(%arg0: i32) -> (i32, i32) {
    %c0_i32 = arith.constant 0 : i32
    %c0_i32_0 = arith.constant 0 : i32
    %c0_i32_1 = arith.constant 0 : i32
    return %c0_i32, %c0_i32_0 : i32, i32
  }
  func.func @transform_2(%arg0: i32) -> (i32, i32) {
    %c0_i32 = arith.constant 0 : i32
    %c0_i32_0 = arith.constant 0 : i32
    %c0_i32_1 = arith.constant 0 : i32
    return %c0_i32, %c0_i32_0 : i32, i32
  }
  func.func @transform_3(%arg0: i32) -> (i32, i32) {
    %c0_i32 = arith.constant 0 : i32
    %c0_i32_0 = arith.constant 0 : i32
    %c0_i32_1 = arith.constant 0 : i32
    return %c0_i32, %c0_i32_0 : i32, i32
  }
  func.func @transform_4(%arg0: i32) -> (i32, i32) {
    %c0_i32 = arith.constant 0 : i32
    %c0_i32_0 = arith.constant 0 : i32
    %c0_i32_1 = arith.constant 0 : i32
    return %c0_i32, %c0_i32_0 : i32, i32
  }
  func.func @transform_5(%arg0: i32) -> (i32, i32) {
    %c0_i32 = arith.constant 0 : i32
    %c0_i32_0 = arith.constant 0 : i32
    %c0_i32_1 = arith.constant 0 : i32
    return %c0_i32, %c0_i32_0 : i32, i32
  }
  func.func @transform_6(%arg0: i32) -> (i32, i32) {
    %c0_i32 = arith.constant 0 : i32
    %c0_i32_0 = arith.constant 0 : i32
    %c0_i32_1 = arith.constant 0 : i32
    return %c0_i32, %c0_i32_0 : i32, i32
  }
  func.func @transform_7(%arg0: i32) -> (i32, i32) {
    %c0_i32 = arith.constant 0 : i32
    %c0_i32_0 = arith.constant 0 : i32
    %c0_i32_1 = arith.constant 0 : i32
    return %c0_i32, %c0_i32_0 : i32, i32
  }
  func.func @transform_8(%arg0: i32) -> (i32, i32) {
    %c0_i32 = arith.constant 0 : i32
    %c0_i32_0 = arith.constant 0 : i32
    %c0_i32_1 = arith.constant 0 : i32
    return %c0_i32, %c0_i32_0 : i32, i32
  }
  func.func @transform_9(%arg0: i32) -> (i32, i32) {
    %c0_i32 = arith.constant 0 : i32
    %c0_i32_0 = arith.constant 0 : i32
    return %arg0, %c0_i32 : i32, i32
  }
}

</mosaic_0001>

<bundles_post_ra>
// kernel: tpu_custom_call.1
= control target key start
LH: loop header
LB: loop body
LE: loop exit
PB: predicated region body
PF: predicated region fallthrough
CT: control target
= control target key end

     0   :  { %14 = vsyncpa [#allocation3], 0  ;;  %s2515_s0 = inlined_call_operand.hbm [shape: f32[2,16,18], index: 0, kind: input, shape index: {}]   ;;  %s2516_s1 = inlined_call_operand.hbm [shape: bf16[13,128], index: 1, kind: input, shape index: {}]   ;;  %s2517_s2 = inlined_call_operand.vmem [shape: f32[1,128], index: 2, kind: input, shape index: {}]   ;;  %s2518_s3 = inlined_call_operand.hbm [shape: bf16[128,256], index: 3, kind: input, shape index: {}]   ;;  %s2519_s4 = inlined_call_operand.vmem [shape: f32[1,256], index: 4, kind: input, shape index: {}]   ;;  %s2520_s5 = inlined_call_operand.hbm [shape: bf16[128,128], index: 5, kind: input, shape index: {}]   ;;  %s2521_s6 = inlined_call_operand.vmem [shape: f32[1,128], index: 6, kind: input, shape index: {}]   ;;  %s2522_s7 = inlined_call_operand.hbm [shape: bf16[128,512], index: 7, kind: input, shape index: {}]   ;;  %s2523_s8 = inlined_call_operand.vmem [shape: f32[1,512], index: 8, kind: input, shape index: {}]   ;;  %s2524_s9 = inlined_call_operand.hbm [shape: f32[2,2048], index: 9, kind: output, shape index: {}]  }
   0x1   :  { %15 = vsyncpa [#allocation6], 0 }
   0x2   :  { %16 = vsyncpa [#allocation9], 0 }
   0x3   :  { %17 = vsyncpa [#allocation4], 0  ;;  %s1911_s30 = smov [#allocation5]   ;;  %s1771_s13 = scalar_lea.hbm %s2516_s1, 128 }
   0x4   :  { %s35_s10 = sshll.u32 %s1911_s30, 4  ;;  %p1772_p0 = scmp.ne.s32.totalorder %s2516_s1, %s1771_s13  ;;  %s36_s10 = int_to_ptr.vmem [resolvable:$true] %s35_s10 }
   0x5   :  { %p1775_p1 = scmp.lt.u32.totalorder %s1771_s13, %s2516_s1 }
   0x7   :  { %p1777_p2 = pnand %p1775_p1, %p1772_p0 }
   0x9   :  { %1780 = shalt.err (!%p1777_p2)
}
   0xa   :  { %s1781_s18 = scalar_lea.vmem %s36_s10, 128  ;;  %p1786_p4 = scmp.lt.s32.totalorder %s36_s10, %s36_s10 }
   0xb   :  { %p1782_p3 = scmp.ne.s32.totalorder %s36_s10, %s1781_s18  ;;  %p1787_p5 = scmp.lt.s32.totalorder %s1781_s18, %s1781_s18 }
   0xd   :  { %p1788_p6 = por %p1787_p5, %p1786_p4 }
   0xf   :  { %p1789_p7 = pnand %p1788_p6, %p1782_p3 }
  0x11   :  { %1792 = shalt.err (!%p1789_p7)
}
  0x12   :  { %s1912_s19 = smov 64   ;;  %s1913_s20 = smov 4  }
  0x13   :  { %41 = dma.hbm_to_vmem [thread:$0]  %s2516_s1, 128, %s36_s10, [#allocation6], %s1912_s19, %s1912_s19, %s1913_s20  }
  0x14   :  { %s1914_s23 = smov [#allocation8]   ;;  %s1915_s25 = smov [#allocation2]  }
  0x15   :  { %s63_s24 = sshll.u32 %s1914_s23, 4  ;;  %s23_s26 = sshll.u32 %s1915_s25, 4  ;;  %s64_s24 = int_to_ptr.vmem [resolvable:$true] %s63_s24  ;;  %s24_s26 = int_to_ptr.vmem [resolvable:$true] %s23_s26 }
  0x16   :  { %s1793_s29 = scalar_lea.hbm %s2520_s5, 1024 }
  0x17   :  { %p1794_p8 = scmp.ne.s32.totalorder %s2520_s5, %s1793_s29  ;;  %p1797_p9 = scmp.lt.u32.totalorder %s1793_s29, %s2520_s5 }
  0x19   :  { %p1799_p10 = pnand %p1797_p9, %p1794_p8 }
  0x1b   :  { %1802 = shalt.err (!%p1799_p10)
}
  0x1c   :  { %s1803_s1 = scalar_lea.vmem %s64_s24, 1024  ;;  %p1808_p12 = scmp.lt.s32.totalorder %s64_s24, %s64_s24 }
  0x1d   :  { %p1804_p11 = scmp.ne.s32.totalorder %s64_s24, %s1803_s1  ;;  %p1809_p13 = scmp.lt.s32.totalorder %s1803_s1, %s1803_s1 }
  0x1f   :  { %p1810_p0 = por %p1809_p13, %p1808_p12 }
  0x21   :  { %p1811_p1 = pnand %p1810_p0, %p1804_p11 }
  0x23   :  { %1814 = shalt.err (!%p1811_p1)
}
  0x24   :  { %69 = dma.hbm_to_vmem [thread:$0]  %s2520_s5, 1024, %s64_s24, [#allocation9], %s1912_s19, %s1912_s19, %s1913_s20  }
  0x25   :  { %s1815_s17 = scalar_lea.hbm %s2515_s0, 512 }
  0x26   :  { %p1816_p2 = scmp.ne.s32.totalorder %s2515_s0, %s1815_s17  ;;  %p1819_p3 = scmp.lt.u32.totalorder %s1815_s17, %s2515_s0 }
  0x28   :  { %p1821_p4 = pnand %p1819_p3, %p1816_p2 }
  0x2a   :  { %1824 = shalt.err (!%p1821_p4)
}
  0x2b   :  { %s1825_s25 = scalar_lea.vmem %s24_s26, 512  ;;  %p1830_p6 = scmp.lt.s32.totalorder %s24_s26, %s24_s26 }
  0x2c   :  { %p1826_p5 = scmp.ne.s32.totalorder %s24_s26, %s1825_s25  ;;  %p1831_p7 = scmp.lt.s32.totalorder %s1825_s25, %s1825_s25 }
  0x2e   :  { %p1832_p8 = por %p1831_p7, %p1830_p6 }
  0x30   :  { %p1833_p9 = pnand %p1832_p8, %p1826_p5 }
  0x32   :  { %1836 = shalt.err (!%p1833_p9)
}
  0x33   :  { %s1916_s5 = smov 128   ;;  %s1917_s19 = smov 8  }
  0x34   :  { %29 = dma.hbm_to_vmem [thread:$0]  %s2515_s0, 512, %s24_s26, [#allocation3], %s1916_s5, %s1916_s5, %s1917_s19  }
  0x35   :  { %s1918_s27 = smov [#allocation7]   ;;  %s1919_s29 = smov [#allocation10]  }
  0x36   :  { %s49_s28 = sshll.u32 %s1918_s27, 4  ;;  %s77_s30 = sshll.u32 %s1919_s29, 4  ;;  %s50_s28 = int_to_ptr.vmem [resolvable:$true] %s49_s28  ;;  %s78_s30 = int_to_ptr.vmem [resolvable:$true] %s77_s30 }
  0x37   :  { %s1837_s13 = scalar_lea.hbm %s2518_s3, 2048 }
  0x38   :  { %p1838_p10 = scmp.ne.s32.totalorder %s2518_s3, %s1837_s13  ;;  %p1841_p11 = scmp.lt.u32.totalorder %s1837_s13, %s2518_s3 }
  0x3a   :  { %p1843_p12 = pnand %p1841_p11, %p1838_p10 }
  0x3c   :  { %1846 = shalt.err (!%p1843_p12)
}
  0x3d   :  { %s1847_s0 = scalar_lea.vmem %s50_s28, 2048  ;;  %p1852_p0 = scmp.lt.s32.totalorder %s50_s28, %s50_s28 }
  0x3e   :  { %p1848_p13 = scmp.ne.s32.totalorder %s50_s28, %s1847_s0  ;;  %p1853_p1 = scmp.lt.s32.totalorder %s1847_s0, %s1847_s0 }
  0x40   :  { %p1854_p2 = por %p1853_p1, %p1852_p0 }
  0x42   :  { %p1855_p3 = pnand %p1854_p2, %p1848_p13 }
  0x44   :  { %1858 = shalt.err (!%p1855_p3)
}
  0x45   :  { %55 = dma.hbm_to_vmem [thread:$0]  %s2518_s3, 2048, %s50_s28, [#allocation6], %s1916_s5, %s1916_s5, %s1917_s19  }
  0x46   :  { %s1859_s21 = scalar_lea.hbm %s2522_s7, 4096 }
  0x47   :  { %p1860_p4 = scmp.ne.s32.totalorder %s2522_s7, %s1859_s21  ;;  %p1863_p5 = scmp.lt.u32.totalorder %s1859_s21, %s2522_s7 }
  0x49   :  { %p1865_p6 = pnand %p1863_p5, %p1860_p4 }
  0x4b   :  { %1868 = shalt.err (!%p1865_p6)
}
  0x4c   :  { %s1869_s24 = scalar_lea.vmem %s78_s30, 4096  ;;  %p1874_p8 = scmp.lt.s32.totalorder %s78_s30, %s78_s30 }
  0x4d   :  { %p1870_p7 = scmp.ne.s32.totalorder %s78_s30, %s1869_s24  ;;  %p1875_p9 = scmp.lt.s32.totalorder %s1869_s24, %s1869_s24 }
  0x4f   :  { %p1876_p10 = por %p1875_p9, %p1874_p8 }
  0x51   :  { %p1877_p11 = pnand %p1876_p10, %p1870_p7 }
  0x53   :  { %1880 = shalt.err (!%p1877_p11)
}
  0x54   :  { %s1920_s3 = smov 256   ;;  %s1921_s5 = smov 16  }
  0x55   :  { %83 = dma.hbm_to_vmem [thread:$0]  %s2522_s7, 4096, %s78_s30, [#allocation9], %s1920_s3, %s1920_s3, %s1921_s5  }
  0x56   :  { %1903 = dma.done.wait [#allocation3], 512  }
  0x57   :  { %1904 = vsyncadd [#allocation3], 4294966784 }
  0x58   :  { %1905 = dma.done.wait [#allocation6], 2176  }
  0x59   :  { %1906 = vsyncadd [#allocation6], 4294965120 }
  0x5a   :  { %1907 = dma.done.wait [#allocation9], 5120  }
  0x5b   :  { %1908 = vsyncadd [#allocation9], 4294962176  ;;  %vm129_vm0 = vcmask 1045504   ;;  %vm130_vm1 = vcmask 1046528   ;;  %v1922_v0 = vmov 65535   ;;  %v2042_v4 = vld [vmem:[#allocation2] sm:$0xff] }
  0x5c   :  { %v131_v1 = vsel %vm129_vm0, 4294967295, %v1922_v0  ;;  %v1690_v3 = vld [vmem:[#allocation5] sm:$0x7f]   ;;  %v2044_v5 = vld [vmem:[#allocation2 + $0x8] sm:$0xff]  ;;  %vm122_vm2 = vcmask 105472   ;;  %v2046_v6 = vld [vmem:[#allocation2 + $0x10] sm:$0xff] }
  0x5d   :  { %v132_v2 = vsel %vm130_vm1, %v131_v1, 0  ;;  %v106_v8 = vpack.c.bf16 %v2044_v5, %v2042_v4  ;;  %v2050_v9 = vld [vmem:[#allocation2 + $0x18] sm:$0xff]  ;;  %v1691_v10 = vld [vmem:[#allocation7 + $0x4] ss:$8 sps:$4 sm:$0xff]   ;;  %v1693_v11 = vld [vmem:[#allocation7] ss:$8 sps:$4 sm:$0xff]  }
  0x5e   :  { %v134_v7 = vand.u32 %v1690_v3, %v132_v2  ;;  %v107_v12 = vpack.c.bf16 %v2050_v9, %v2046_v6  ;;  %v1694_v13 = vld [vmem:[#allocation7 + $0x14] ss:$8 sps:$4 sm:$0xff]   ;;  %299 = vmatprep.subr.bf16.mxu1 %v1691_v10  ;;  %v1696_v14 = vld [vmem:[#allocation7 + $0x10] ss:$8 sps:$4 sm:$0xff]   ;;  %v1697_v15 = vld [vmem:[#allocation7 + $0x24] ss:$8 sps:$4 sm:$0xff]  }
  0x5f   :  { %1631 = vmatprep.mubr.msk.bf16.mxu0 %vm122_vm2, %v106_v8  ;;  %300 = vmatpush1.bf16.msra.mxu1 %v1693_v11  ;;  %v1699_v16 = vld [vmem:[#allocation7 + $0x20] ss:$8 sps:$4 sm:$0xff]   ;;  %v1700_v17 = vld [vmem:[#allocation7 + $0x34] ss:$8 sps:$4 sm:$0xff]   ;;  %v1702_v18 = vld [vmem:[#allocation7 + $0x30] ss:$8 sps:$4 sm:$0xff]  }
  0x60   :  { %1629 = vmatprep.subr.bf16.mxu0 %v134_v7  ;;  %301 = vmatprep.subr.bf16.mxu1 %v1694_v13  ;;  %v1703_v19 = vld [vmem:[#allocation7 + $0x44] ss:$8 sps:$4 sm:$0xff]   ;;  %v1705_v20 = vld [vmem:[#allocation7 + $0x40] ss:$8 sps:$4 sm:$0xff]   ;;  %v1706_v21 = vld [vmem:[#allocation7 + $0x54] ss:$8 sps:$4 sm:$0xff]  }
  0x61   :  { %1630 = vmatpush3.bf16.msra.mxu0 %v134_v7  ;;  %v1708_v22 = vld [vmem:[#allocation7 + $0x50] ss:$8 sps:$4 sm:$0xff]   ;;  %v1709_v23 = vld [vmem:[#allocation7 + $0x64] ss:$8 sps:$4 sm:$0xff]   ;;  %v1711_v24 = vld [vmem:[#allocation7 + $0x60] ss:$8 sps:$4 sm:$0xff]  }
  0x62   :  { %v1712_v25 = vld [vmem:[#allocation7 + $0x74] ss:$8 sps:$4 sm:$0xff]   ;;  %v1714_v26 = vld [vmem:[#allocation7 + $0x70] ss:$8 sps:$4 sm:$0xff]   ;;  %v1923_v27 = vmov 0   ;;  %v1721_v29 = vld [vmem:[#allocation8] sm:$0xff]  }
  0x63   :  { %302 = vmatpush1.bf16.msra.mxu1 %v1696_v14  ;;  %331 = vmatprep.mubr.bf16.mxu1 %v1923_v27  ;;  %v1717_v28 = vld [vmem:[#allocation10 + $0x4] ss:$16 sps:$4 sm:$0xff]   ;;  %s1924_s7 = smov 115   ;;  %v1725_v30 = vld [vmem:[#allocation8 + $0x8] sm:$0xff]   ;;  %vm1040_vm3 = vcmp.ne.f32.partialorder %v2042_v4, 0.0  ;;  %v1925_v31 = vmov 13  }
  0x64   :  { %1632 = vmatmul.mubr.msk.bf16.vlgmr.msra.gmra.mrb[0].mxu0 %vm122_vm2, %v107_v12  ;;  %303 = vmatprep.subr.bf16.mxu1 %v1697_v15  ;;  %v1729_v32 = vld [vmem:[#allocation8 + $0x10] sm:$0xff]   ;;  %v2065_v33 = vsel %vm1040_vm3, 1, %v1923_v27  ;;  %vm1043_vm4 = vcmp.ne.f32.partialorder %v2050_v9, 0.0  ;;  %v1733_v34 = vld [vmem:[#allocation8 + $0x18] sm:$0xff]   ;;  %vm1042_vm5 = vcmp.ne.f32.partialorder %v2046_v6, 0.0  ;;  %v1926_v37 = vmov 14  }
  0x65   :  { %921 = vrot.lane.b32.xlu1 %v2042_v4, %s1924_s7  ;;  %925 = vrot.lane.b32.xlu0 %v2046_v6, %s1924_s7  ;;  %v2071_v35 = vsel %vm1043_vm4, 1, %v1923_v27  ;;  %v2074_v36 = vsel %vm1042_vm5, 1, %v1923_v27  ;;  %v1555_v38 = vld [vmem:[%s2517_s2] ss:$0 sm:$0xff]  ;;  %v1715_v52 = vld [vmem:[#allocation10] ss:$16 sps:$4 sm:$0xff]  }
  0x66   :  { %1635 = vmatprep.subr.bf16.mxu0 %v1721_v29  ;;  %1676 = vset.pattern.permute.xlu1 %v1925_v31  ;;  %v1720_v54 = vld [vmem:[#allocation10 + $0x24] ss:$16 sps:$4 sm:$0xff]   ;;  %v1718_v55 = vld [vmem:[#allocation10 + $0x20] ss:$16 sps:$4 sm:$0xff]   ;;  %v1741_v3 = vld [vmem:[#allocation8 + $0x28] sm:$0xff]   ;;  %v1927_v7 = vmov 15  }
  0x67   :  { %304 = vmatpush1.bf16.msra.mxu1 %v1699_v16  ;;  %1636 = vmatpush3.bf16.msra.mxu0 %v1721_v29  ;;  %v1724_v56 = vld [vmem:[#allocation10 + $0x44] ss:$16 sps:$4 sm:$0xff]   ;;  %v1722_v57 = vld [vmem:[#allocation10 + $0x40] ss:$16 sps:$4 sm:$0xff]   ;;  %vm1041_vm6 = vcmp.ne.f32.partialorder %v2044_v5, 0.0  ;;  %v1928_v11 = vmov 16  }
  0x68   :  { %305 = vmatprep.subr.bf16.mxu1 %v1700_v17  ;;  %1637 = vmatprep.subr.bf16.mxu0 %v1725_v30  ;;  %v1728_v58 = vld [vmem:[#allocation10 + $0x64] ss:$16 sps:$4 sm:$0xff]   ;;  %v1726_v59 = vld [vmem:[#allocation10 + $0x60] ss:$16 sps:$4 sm:$0xff]   ;;  %v1749_v10 = vld [vmem:[#allocation10 + $0xc] ss:$16 sps:$4 sm:$0xff]  }
  0x69   :  { %1677 = vset.pattern.permute.xlu0 %v1925_v31  ;;  %923 = vrot.lane.b32.xlu1 %v2044_v5, %s1924_s7  ;;  %v1732_v60 = vld [vmem:[#allocation10 + $0x84] ss:$16 sps:$4 sm:$0xff]   ;;  %v1730_v61 = vld [vmem:[#allocation10 + $0x80] ss:$16 sps:$4 sm:$0xff]   ;;  %v1045_v12 = vsel %vm1041_vm6, 1, %v1923_v27  ;;  %v1929_v13 = vmov 17  }
  0x6a   :  { %927 = vrot.lane.b32.xlu0 %v2050_v9, %s1924_s7  ;;  %v1736_v62 = vld [vmem:[#allocation10 + $0xa4] ss:$16 sps:$4 sm:$0xff]   ;;  %v1734_v63 = vld [vmem:[#allocation10 + $0xa0] ss:$16 sps:$4 sm:$0xff]   ;;  %v1746_v9 = vld [vmem:[#allocation8 + $0x38] sm:$0xff]   ;;  %vm933_vm7 = vcmask 39936  }
  0x6b   :  { %306 = vmatpush1.bf16.msra.mxu1 %v1702_v18  ;;  %1638 = vmatpush3.bf16.msra.mxu0 %v1725_v30  ;;  %v1737_v0 = vld [vmem:[#allocation8 + $0x20] sm:$0xff]   ;;  %v1745_v8 = vld [vmem:[#allocation8 + $0x30] sm:$0xff]  }
  0x6c   :  { %307 = vmatprep.subr.bf16.mxu1 %v1703_v19  ;;  %1639 = vmatprep.subr.bf16.mxu0 %v1729_v32  ;;  %v1740_v1 = vld [vmem:[#allocation10 + $0xc4] ss:$16 sps:$4 sm:$0xff]   ;;  %v1738_v2 = vld [vmem:[#allocation10 + $0xc0] ss:$16 sps:$4 sm:$0xff]  }
  0x6d   :  { %1049 = vperm.xlu1 %1676, %v2065_v33   ;;  %v1744_v4 = vld [vmem:[#allocation10 + $0xe4] ss:$16 sps:$4 sm:$0xff]   ;;  %v1742_v6 = vld [vmem:[#allocation10 + $0xe0] ss:$16 sps:$4 sm:$0xff]  }
  0x6e   :  { %1055 = vperm.xlu0 %1677, %v2074_v36  }
  0x6f   :  { %308 = vmatpush1.bf16.msra.mxu1 %v1705_v20  ;;  %1640 = vmatpush3.bf16.msra.mxu0 %v1729_v32 }
  0x70   :  { %309 = vmatprep.subr.bf16.mxu1 %v1706_v21  ;;  %1641 = vmatprep.subr.bf16.mxu0 %v1733_v34  ;;  %v209_v21 = vlaneseq }
  0x71   :  { %1058 = vperm.xlu1 %1676, %v2071_v35  }
  0x72   :  { %1684 = vset.pattern.permute.xlu0 %v1926_v37 }
  0x73   :  { %310 = vmatpush1.bf16.msra.mxu1 %v1708_v22  ;;  %1642 = vmatpush3.bf16.msra.mxu0 %v1733_v34  ;;  %v2101_v22 = vshrl.u32 %v209_v21, 7 }
  0x74   :  { %311 = vmatprep.subr.bf16.mxu1 %v1709_v23  ;;  %1643 = vmatprep.subr.bf16.mxu0 %v1737_v0 }
  0x75   :  { %1678 = vset.pattern.permute.xlu1 %v1926_v37  ;;  %1150 = vperm.xlu0 %1684, %v1045_v12   ;;  %v211_v23 = vsub.s32 0, %v2101_v22 }
  0x76   :  { %1153 = vperm.xlu1 %1678, %v2074_v36  }
  0x77   :  { %312 = vmatpush1.bf16.msra.mxu1 %v1711_v24  ;;  %1644 = vmatpush3.bf16.msra.mxu0 %v1737_v0  ;;  %v207_v24 = vld [vmem:[%s2519_s4] sm:$0x3]  ;;  %v1761_v0 = vld [vmem:[#allocation10 + $0x8c] ss:$16 sps:$4 sm:$0xff]  }
  0x78   :  { %313 = vmatprep.subr.bf16.mxu1 %v1712_v25  ;;  %1645 = vmatprep.subr.bf16.mxu0 %v1741_v3  ;;  %v215_v25 = vsub.s32 1, %v2101_v22 }
  0x79   :  { %1686 = vset.pattern.permute.xlu0 %v1928_v11 }
  0x7a   :  { %1156 = vperm.xlu1 %1678, %v2071_v35   ;;  %1343 = vperm.xlu0 %1686, %v2065_v33  }
  0x7b   :  { %314 = vmatpush1.bf16.msra.mxu1 %v1714_v26  ;;  %1646 = vmatpush3.bf16.msra.mxu0 %v1741_v3  ;;  %v212_v26 = vrot.slane %v207_v24, %v211_v23  ;;  %v1762_v3 = vld [vmem:[#allocation10 + $0xa8] ss:$16 sps:$4 sm:$0xff]  }
  0x7c   :  { %698 = vmatprep.subr.bf16.mxu1 %v1717_v28  ;;  %1647 = vmatprep.subr.bf16.mxu0 %v1745_v8  ;;  %v216_v28 = vrot.slane %v207_v24, %v215_v25 }
  0x7e   :  { %1679 = vset.pattern.permute.xlu1 %v1927_v7  ;;  %1687 = vset.pattern.permute.xlu0 %v1929_v13 }
  0x7f   :  { %1251 = vperm.xlu1 %1679, %v2074_v36   ;;  %1648 = vmatpush3.bf16.msra.mxu0 %v1745_v8  ;;  %v1768_v8 = vld [vmem:[#allocation10 + $0xe8] ss:$16 sps:$4 sm:$0xff]  }
  0x80   :  { %1649 = vmatprep.subr.bf16.mxu0 %v1746_v9  ;;  %1450 = vperm.xlu0 %1687, %v2071_v35  }
  0x83   :  { %1254 = vperm.xlu1 %1679, %v2071_v35   ;;  %1650 = vmatpush3.bf16.msra.mxu0 %v1746_v9 }
  0x84   :  { %751 = vmatprep.subr.bf16.mxu0 %v1749_v10 }
  0x87   :  { %1680 = vset.pattern.permute.xlu1 %v1928_v11 }
  0x88   :  { %1349 = vperm.xlu1 %1680, %v2074_v36  }
  0x8c   :  { %1352 = vperm.xlu1 %1680, %v2071_v35  }
  0x90   :  { %1681 = vset.pattern.permute.xlu1 %v1929_v13 }
  0x91   :  { %1447 = vperm.xlu1 %1681, %v2074_v36  }
  0x95   :  { %1682 = vset.pattern.permute.xlu1 %v1925_v31 }
  0x96   :  { %1052 = vperm.xlu1 %1682, %v1045_v12  }
  0x9a   :  { %1683 = vset.pattern.permute.xlu1 %v1926_v37 }
  0x9b   :  { %1147 = vperm.xlu1 %1683, %v2065_v33  }
  0x9f   :  { %1685 = vset.pattern.permute.xlu1 %v1927_v7  ;;  %v1770_v7 = vld [vmem:[#allocation10 + $0xec] ss:$16 sps:$4 sm:$0xff]  }
  0xa0   :  { %1245 = vperm.xlu1 %1685, %v2065_v33  }
  0xa4   :  { %1248 = vperm.xlu1 %1685, %v1045_v12  }
  0xa8   :  { %1688 = vset.pattern.permute.xlu1 %v1928_v11 }
  0xa9   :  { %1346 = vperm.xlu1 %1688, %v1045_v12  }
  0xad   :  { %1689 = vset.pattern.permute.xlu1 %v1929_v13 }
  0xd7   :  { %v922_v5 = vpop.permute.xlu1 %921  ;;  %v926_v14 = vpop.permute.xlu0 %925 }
  0xd8   :  { %v934_v15 = vsel %vm933_vm7, %v922_v5, 0.0  ;;  %v940_v16 = vsel %vm933_vm7, %v926_v14, 0.0 }
  0xd9   :  { %935 = vadd.xlane.f32.xlu0 %v934_v15 }
  0xdb   :  { %v924_v19 = vpop.permute.xlu1 %923 }
  0xdc   :  { %v928_v17 = vpop.permute.xlu0 %927  ;;  %v937_v20 = vsel %vm933_vm7, %v924_v19, 0.0 }
  0xdd   :  { %941 = vadd.xlane.f32.xlu0 %v940_v16  ;;  %v943_v18 = vsel %vm933_vm7, %v928_v17, 0.0  ;;  %938 = vadd.xlane.f32.xlu1 %v937_v20 }
  0xe1   :  { %944 = vadd.xlane.f32.xlu0 %v943_v18 }
  0xec   :  { %v2115_v9 = vpop.permute.xlu1 %1049 }
  0xed   :  { %vm1060_vm9 = vcmp.eq.s32.totalorder %v2115_v9, 1 }
  0xee   :  { %1441 = vperm.xlu1 %1689, %v2065_v33  }
  0xf0   :  { %v2117_v10 = vpop.permute.xlu1 %1058 }
  0xf1   :  { %vm1063_vm0 = vcmp.eq.s32.totalorder %v2117_v10, 1 }
  0xf5   :  { %v2119_v11 = vpop.permute.xlu1 %1153 }
  0xf6   :  { %vm1160_vm10 = vcmp.eq.s32.totalorder %v2119_v11, 1 }
  0xf7   :  { %1444 = vperm.xlu0 %1687, %v1045_v12  }
  0xf9   :  { %v2121_v12 = vpop.permute.xlu1 %1156 }
  0xfa   :  { %vm1161_vm1 = vcmp.eq.s32.totalorder %v2121_v12, 1 }
  0xfe   :  { %v2123_v13 = vpop.permute.xlu1 %1251 }
  0xff   :  { %vm1258_vm11 = vcmp.eq.s32.totalorder %v2123_v13, 1 }
 0x102   :  { %v2125_v5 = vpop.permute.xlu1 %1254 }
 0x103   :  { %vm1259_vm7 = vcmp.eq.s32.totalorder %v2125_v5, 1 }
 0x107   :  { %v2127_v14 = vpop.permute.xlu1 %1349 }
 0x108   :  { %vm1356_vm12 = vcmp.eq.s32.totalorder %v2127_v14, 1 }
 0x10b   :  { %v2129_v15 = vpop.permute.xlu1 %1352 }
 0x110   :  { %v2131_v16 = vpop.permute.xlu1 %1447 }
 0x111   :  { %vm1454_vm14 = vcmp.eq.s32.totalorder %v2131_v16, 1 }
 0x115   :  { %v2135_v17 = vpop.permute.xlu1 %1052 }
 0x11a   :  { %v2139_v19 = vpop.permute.xlu1 %1147 }
 0x11b   :  { %vm1158_vm15 = vcmp.eq.s32.totalorder %v2139_v19, 1 }
 0x11f   :  { %v2143_v21 = vpop.permute.xlu1 %1245 }
 0x120   :  { %vm1256_vm4 = vcmp.eq.s32.totalorder %v2143_v21, 1 }
 0x137   :  { %v1633_v39 = vpop.f32.mrb[0].mxu0 }
 0x138   :  { %v179_v40 = vadd.f32 %v1633_v39, %v1555_v38  ;;  %v170_v41 = vpop.f32.mrb[1].mxu0 }
 0x139   :  { %v171_v42 = vadd.f32 %v1555_v38, %v170_v41  ;;  %v1634_v43 = vpop.f32.mrb[2].mxu0 }
 0x13a   :  { %v182_v44 = vadd.f32 %v1634_v43, %v1555_v38  ;;  %v173_v45 = vpop.f32.mrb[3].mxu0  ;;  %v187_v47 = vmax.f32 %v179_v40, 0.0 }
 0x13b   :  { %v174_v46 = vadd.f32 %v1555_v38, %v173_v45  ;;  %v185_v49 = vmax.f32 %v171_v42, 0.0 }
 0x13c   :  { %v188_v48 = vmax.f32 %v182_v44, 0.0 }
 0x13d   :  { %v186_v50 = vmax.f32 %v174_v46, 0.0 }
 0x13e   :  { %v190_v51 = vpack.c.bf16 %v188_v48, %v187_v47 }
 0x13f   :  { %v189_v53 = vpack.c.bf16 %v186_v50, %v185_v49 }
 0x141   :  { %332 = vmatmul.mubr.bf16.vlgmr.msra.gmra.mrb[0].mxu1 %v189_v53 }
 0x142   :  { %341 = vmatprep.mubr.bf16.mxu1 %v1923_v27  ;;  %699 = vmatpush1.bf16.msra.mxu1 %v1715_v52 }
 0x143   :  { %700 = vmatprep.subr.bf16.mxu1 %v1720_v54 }
 0x146   :  { %701 = vmatpush1.bf16.msra.mxu1 %v1718_v55  ;;  %v1747_v55 = vld [vmem:[#allocation10 + $0x8] ss:$16 sps:$4 sm:$0xff]  }
 0x147   :  { %702 = vmatprep.subr.bf16.mxu1 %v1724_v56 }
 0x149   :  { %342 = vmatmul.mubr.bf16.gmra.mrb[4].mxu1 %v190_v51 }
 0x14a   :  { %703 = vmatpush1.bf16.msra.mxu1 %v1722_v57  ;;  %730 = vmatprep.mubr.bf16.mxu1 %v1923_v27  ;;  %v1752_v57 = vld [vmem:[#allocation10 + $0x2c] ss:$16 sps:$4 sm:$0xff]  }
 0x14b   :  { %704 = vmatprep.subr.bf16.mxu1 %v1728_v58 }
 0x14e   :  { %705 = vmatpush1.bf16.msra.mxu1 %v1726_v59  ;;  %v1750_v59 = vld [vmem:[#allocation10 + $0x28] ss:$16 sps:$4 sm:$0xff]  }
 0x14f   :  { %706 = vmatprep.subr.bf16.mxu1 %v1732_v60  ;;  %v1755_v60 = vld [vmem:[#allocation10 + $0x4c] ss:$16 sps:$4 sm:$0xff]  }
 0x152   :  { %707 = vmatpush1.bf16.msra.mxu1 %v1730_v61  ;;  %v1753_v61 = vld [vmem:[#allocation10 + $0x48] ss:$16 sps:$4 sm:$0xff]  }
 0x153   :  { %708 = vmatprep.subr.bf16.mxu1 %v1736_v62  ;;  %v1758_v62 = vld [vmem:[#allocation10 + $0x6c] ss:$16 sps:$4 sm:$0xff]  }
 0x156   :  { %709 = vmatpush1.bf16.msra.mxu1 %v1734_v63  ;;  %v1756_v63 = vld [vmem:[#allocation10 + $0x68] ss:$16 sps:$4 sm:$0xff]  }
 0x157   :  { %710 = vmatprep.subr.bf16.mxu1 %v1740_v1  ;;  %v1759_v1 = vld [vmem:[#allocation10 + $0x88] ss:$16 sps:$4 sm:$0xff]  }
 0x15a   :  { %711 = vmatpush1.bf16.msra.mxu1 %v1738_v2  ;;  %v1764_v2 = vld [vmem:[#allocation10 + $0xac] ss:$16 sps:$4 sm:$0xff]  }
 0x15b   :  { %712 = vmatprep.subr.bf16.mxu1 %v1744_v4  ;;  %v1767_v4 = vld [vmem:[#allocation10 + $0xcc] ss:$16 sps:$4 sm:$0xff]  }
 0x15e   :  { %713 = vmatpush1.bf16.msra.mxu1 %v1742_v6  ;;  %v1765_v6 = vld [vmem:[#allocation10 + $0xc8] ss:$16 sps:$4 sm:$0xff]  }
 0x214   :  { %v333_v29 = vpop.f32.mrb[0].mxu1 }
 0x215   :  { %v334_v30 = vadd.f32 %v333_v29, %v212_v26  ;;  %v335_v31 = vpop.f32.mrb[1].mxu1 }
 0x216   :  { %v336_v32 = vadd.f32 %v335_v31, %v216_v28  ;;  %v337_v33 = vpop.f32.mrb[2].mxu1  ;;  %v1930_v31 = vmov 1983009808  }
 0x217   :  { %v338_v34 = vadd.f32 %v337_v33, %v212_v26  ;;  %v339_v35 = vpop.f32.mrb[3].mxu1  ;;  %v352_v37 = vmax.f32 %v334_v30, 0.0  ;;  %v516_v30 = vld [vmem:[%s2523_s8] sm:$0xf] }
 0x218   :  { %v340_v36 = vadd.f32 %v339_v35, %v216_v28  ;;  %v353_v39 = vmax.f32 %v336_v32, 0.0  ;;  %v871_v32 = vunpack.c.l.s4 %v1930_v31  ;;  %v2158_v33 = vrot.slane %v516_v30, %v211_v23 }
 0x219   :  { %v354_v38 = vmax.f32 %v338_v34, 0.0  ;;  %v2162_v35 = vrot.slane %v516_v30, %v215_v25 }
 0x21a   :  { %v355_v40 = vmax.f32 %v340_v36, 0.0 }
 0x21b   :  { %v360_v41 = vpack.c.bf16 %v354_v38, %v352_v37 }
 0x21c   :  { %v361_v42 = vpack.c.bf16 %v355_v40, %v353_v39  ;;  %v343_v43 = vpop.f32.mrb[4].mxu1  ;;  %v872_v40 = vunpack.c.0.s8 %v871_v32 }
 0x21d   :  { %v344_v44 = vadd.f32 %v343_v43, %v212_v26  ;;  %v345_v45 = vpop.f32.mrb[5].mxu1  ;;  %1651 = vmatprep.mubr.bf16.mxu0 %v360_v41 }
 0x21e   :  { %v346_v46 = vadd.f32 %v345_v45, %v216_v28  ;;  %v347_v47 = vpop.f32.mrb[6].mxu1  ;;  %731 = vmatmul.mubr.bf16.vlgmr.msra.gmra.mrb[8].mxu1 %v361_v42  ;;  %v1575_v45 = vld [vmem:[%s2521_s6] ss:$0 sm:$0xff]  ;;  %s1931_s6 = smov [#allocation11]  }
 0x21f   :  { %v348_v48 = vadd.f32 %v347_v47, %v212_v26  ;;  %v349_v49 = vpop.f32.mrb[7].mxu1  ;;  %740 = vmatprep.mubr.bf16.mxu1 %v1923_v27  ;;  %v356_v51 = vmax.f32 %v344_v44, 0.0  ;;  %v2147_v26 = vpop.permute.xlu1 %1248  ;;  %s1544_s13 = sshll.u32 %s1931_s6, 4  ;;  %s1545_s13 = int_to_ptr.vmem [resolvable:$true] %s1544_s13 }
 0x220   :  { %v350_v50 = vadd.f32 %v349_v49, %v216_v28  ;;  %v357_v53 = vmax.f32 %v346_v46, 0.0  ;;  %v528_v46 = vsub.s32 2, %v2101_v22  ;;  %v532_v49 = vsub.s32 3, %v2101_v22  ;;  %s1881_s1 = scalar_lea.vmem %s1545_s13, 512  ;;  %p1886_p13 = scmp.lt.s32.totalorder %s1545_s13, %s1545_s13 }
 0x221   :  { %v358_v52 = vmax.f32 %v348_v48, 0.0  ;;  %p1882_p12 = scmp.ne.s32.totalorder %s1545_s13, %s1881_s1  ;;  %p1887_p0 = scmp.lt.s32.totalorder %s1881_s1, %s1881_s1 }
 0x222   :  { %v359_v54 = vmax.f32 %v350_v50, 0.0  ;;  %v2184_v50 = vsub.s32 %v872_v40, %v2101_v22 }
 0x223   :  { %v362_v56 = vpack.c.bf16 %v358_v52, %v356_v51  ;;  %v2149_v28 = vpop.permute.xlu1 %1346  ;;  %p1888_p1 = por %p1887_p0, %p1886_p13 }
 0x224   :  { %v363_v58 = vpack.c.bf16 %v359_v54, %v357_v53 }
 0x225   :  { %1652 = vmatmul.mubr.bf16.vlgmr.msra.gmra.mrb[4].mxu0 %v362_v56  ;;  %p1889_p2 = pnand %p1888_p1, %p1882_p12 }
 0x226   :  { %752 = vmatpush1.bf16.msra.mxu0 %v1747_v55  ;;  %741 = vmatmul.mubr.bf16.gmra.mrb[12].mxu1 %v363_v58 }
 0x227   :  { %753 = vmatprep.subr.bf16.mxu0 %v1752_v57  ;;  %783 = vmatprep.mubr.bf16.mxu0 %v1923_v27  ;;  %v2164_v36 = vpop.xlane.xlu1 %938 }
 0x22a   :  { %754 = vmatpush1.bf16.msra.mxu0 %v1750_v59 }
 0x22b   :  { %755 = vmatprep.subr.bf16.mxu0 %v1755_v60  ;;  %v1442_v48 = vpop.permute.xlu1 %1441 }
 0x22c   :  { %vm1452_vm6 = vcmp.eq.s32.totalorder %v1442_v48, 1 }
 0x22e   :  { %756 = vmatpush1.bf16.msra.mxu0 %v1753_v61  ;;  %v2190_v61 = vrot.slane %v516_v30, %v528_v46 }
 0x22f   :  { %757 = vmatprep.subr.bf16.mxu0 %v1758_v62 }
 0x232   :  { %758 = vmatpush1.bf16.msra.mxu0 %v1756_v63 }
 0x233   :  { %759 = vmatprep.subr.bf16.mxu0 %v1761_v0 }
 0x236   :  { %760 = vmatpush1.bf16.msra.mxu0 %v1759_v1 }
 0x237   :  { %761 = vmatprep.subr.bf16.mxu0 %v1764_v2 }
 0x23a   :  { %762 = vmatpush1.bf16.msra.mxu0 %v1762_v3  ;;  %v2198_v3 = vrot.slane %v516_v30, %v532_v49 }
 0x23b   :  { %763 = vmatprep.subr.bf16.mxu0 %v1767_v4 }
 0x23e   :  { %764 = vmatpush1.bf16.msra.mxu0 %v1765_v6 }
 0x23f   :  { %765 = vmatprep.subr.bf16.mxu0 %v1770_v7 }
 0x242   :  { %766 = vmatpush1.bf16.msra.mxu0 %v1768_v8 }
 0x245   :  { %784 = vmatmul.mubr.bf16.vlgmr.msra.gmra.mrb[8].mxu0 %v361_v42 }
 0x246   :  { %793 = vmatprep.mubr.bf16.mxu0 %v1923_v27  ;;  %v2133_v27 = vpop.permute.xlu0 %1055 }
 0x247   :  { %vm1062_vm8 = vcmp.eq.s32.totalorder %v2133_v27, 1 }
 0x24a   :  { %v2137_v18 = vpop.permute.xlu0 %1150 }
 0x24d   :  { %794 = vmatmul.mubr.bf16.gmra.mrb[12].mxu0 %v363_v58 }
 0x24e   :  { %v2141_v20 = vpop.permute.xlu0 %1343 }
 0x24f   :  { %vm1354_vm13 = vcmp.eq.s32.totalorder %v2141_v20, 1 }
 0x252   :  { %v2145_v24 = vpop.permute.xlu0 %1450 }
 0x256   :  { %v2151_v29 = vpop.xlane.xlu0 %935 }
 0x257   :  { %vm946_vm2 = vcmp.lt.f32.partialorder %v2151_v29, 0.9 }
 0x25a   :  { %v942_v37 = vpop.xlane.xlu0 %941 }
 0x25b   :  { %vm948_vm3 = vcmp.lt.f32.partialorder %v942_v37, 0.9 }
 0x25e   :  { %v945_v51 = vpop.xlane.xlu0 %944 }
 0x25f   :  { %vm949_vm5 = vcmp.lt.f32.partialorder %v945_v51, 0.9 }
 0x2f1   :  { %v732_v34 = vpop.f32.mrb[8].mxu1 }
 0x2f2   :  { %v734_v38 = vpop.f32.mrb[9].mxu1  ;;  %v733_v41 = vadd.f32 %v732_v34, %v2158_v33 }
 0x2f3   :  { %v736_v39 = vpop.f32.mrb[10].mxu1  ;;  %v735_v23 = vadd.f32 %v734_v38, %v2162_v35 }
 0x2f4   :  { %v737_v42 = vadd.f32 %v736_v39, %v2158_v33  ;;  %v738_v43 = vpop.f32.mrb[11].mxu1 }
 0x2f5   :  { %v739_v25 = vadd.f32 %v738_v43, %v2162_v35 }
 0x2f6   :  { %v804_v44 = vmax.f32 %v733_v41, %v737_v42 }
 0x2f7   :  { %v811_v47 = vmax.f32 %v735_v23, %v739_v25 }
 0x2f8   :  { %v805_v52 = vrot.slane %v804_v44, 4  ;;  %v1653_v53 = vpop.f32.mrb[4].mxu0 }
 0x2f9   :  { %v812_v54 = vrot.slane %v811_v47, 4  ;;  %v478_v55 = vadd.f32 %v1653_v53, %v1575_v45  ;;  %v469_v56 = vpop.f32.mrb[5].mxu0  ;;  %v742_v57 = vpop.f32.mrb[12].mxu1 }
 0x2fa   :  { %v806_v58 = vmax.f32 %v804_v44, %v805_v52  ;;  %v470_v22 = vadd.f32 %v1575_v45, %v469_v56  ;;  %v1654_v59 = vpop.f32.mrb[6].mxu0  ;;  %v744_v60 = vpop.f32.mrb[13].mxu1  ;;  %v2196_v0 = vadd.f32 %v742_v57, %v2158_v33 }
 0x2fb   :  { %v813_v62 = vmax.f32 %v811_v47, %v812_v54  ;;  %v1164_v63 = vsel %vm1160_vm10, %v478_v55, 0.0  ;;  %v472_v1 = vpop.f32.mrb[7].mxu0  ;;  %v746_v2 = vpop.f32.mrb[14].mxu1  ;;  %v960_v6 = vsel %vm948_vm3, %v478_v55, 0.0  ;;  %v1066_v7 = vsel %vm1062_vm8, %v478_v55, 0.0 }
 0x2fc   :  { %v807_v4 = vrot.slane %v806_v58, 2  ;;  %v1262_v8 = vsel %vm1258_vm11, %v478_v55, 0.0  ;;  %v748_v31 = vpop.f32.mrb[15].mxu1  ;;  %v2207_v11 = vsel %vm1356_vm12, %v478_v55, 0.0  ;;  %v2211_v34 = vsel %vm1454_vm14, %v478_v55, 0.0 }
 0x2fd   :  { %v814_v32 = vrot.slane %v813_v62, 2  ;;  %v2215_v30 = vsel %vm946_vm2, %v470_v22, 0.0  ;;  %v2219_v27 = vsel %vm1060_vm9, %v470_v22, 0.0  ;;  %v2223_v13 = vsel %vm1158_vm15, %v470_v22, 0.0 }
 0x2fe   :  { %v808_v37 = vmax.f32 %v806_v58, %v807_v4  ;;  %v2227_v14 = vsel %vm1256_vm4, %v470_v22, 0.0  ;;  %v2231_v38 = vsel %vm1354_vm13, %v470_v22, 0.0  ;;  %v2234_v29 = vsel %vm1452_vm6, %v470_v22, 0.0 }
 0x2ff   :  { %v815_v16 = vmax.f32 %v813_v62, %v814_v32  ;;  %v2236_v39 = vadd.f32 %v1654_v59, %v1575_v45  ;;  %v2239_v40 = vadd.f32 %v744_v60, %v2162_v35  ;;  %v2241_v19 = vadd.f32 %v1575_v45, %v472_v1 }
 0x300   :  { %v809_v9 = vrot.slane %v808_v37, 1  ;;  %v2244_v21 = vadd.f32 %v746_v2, %v2158_v33  ;;  %vm947_vm8 = vcmp.lt.f32.partialorder %v2164_v36, 0.9  ;;  %vm1357_vm9 = vcmp.eq.s32.totalorder %v2129_v15, 1 }
 0x301   :  { %v816_v41 = vrot.slane %v815_v16, 1  ;;  %v961_v20 = vsel %vm949_vm5, %v2236_v39, 0.0  ;;  %v1067_v42 = vsel %vm1063_vm0, %v2236_v39, 0.0  ;;  %v1165_v43 = vsel %vm1161_vm1, %v2236_v39, 0.0 }
 0x302   :  { %v2254_v23 = vmax.f32 %v808_v37, %v809_v9  ;;  %v969_v25 = vmax.f32 %v960_v6, %v961_v20  ;;  %v983_v44 = vmin.f32 %v960_v6, %v961_v20  ;;  %v1075_v45 = vmax.f32 %v1066_v7, %v1067_v42 }
 0x303   :  { %v2256_v46 = vmax.f32 %v815_v16, %v816_v41  ;;  %v1089_v33 = vmin.f32 %v1066_v7, %v1067_v42  ;;  %v1173_v47 = vmax.f32 %v1164_v63, %v1165_v43  ;;  %v1187_v48 = vmin.f32 %v1164_v63, %v1165_v43 }
 0x304   :  { %v970_v49 = vrot.slane %v969_v25, 4  ;;  %v984_v51 = vrot.slane %v983_v44, 4  ;;  %v1076_v52 = vrot.slane %v1075_v45, 4  ;;  %v1263_v10 = vsel %vm1259_vm7, %v2236_v39, 0.0 }
 0x305   :  { %v868_v12 = vcombine.low %v2254_v23, %v2256_v46  ;;  %v1090_v53 = vrot.slane %v1089_v33, 4  ;;  %v1174_v54 = vrot.slane %v1173_v47, 4  ;;  %v1188_v55 = vrot.slane %v1187_v48, 4 }
 0x306   :  { %v971_v56 = vmax.f32 %v969_v25, %v970_v49  ;;  %v985_v57 = vmin.f32 %v983_v44, %v984_v51  ;;  %v1077_v58 = vmax.f32 %v1075_v45, %v1076_v52  ;;  %v1271_v22 = vmax.f32 %v1262_v8, %v1263_v10 }
 0x307   :  { %v1091_v59 = vmin.f32 %v1089_v33, %v1090_v53  ;;  %v1175_v60 = vmax.f32 %v1173_v47, %v1174_v54  ;;  %v1189_v62 = vmin.f32 %v1187_v48, %v1188_v55  ;;  %v2264_v63 = vadd.f32 %v748_v31, %v2162_v35 }
 0x308   :  { %v972_v1 = vrot.slane %v971_v56, 2  ;;  %v986_v2 = vrot.slane %v985_v57, 2  ;;  %v1078_v5 = vrot.slane %v1077_v58, 2  ;;  %v1272_v4 = vrot.slane %v1271_v22, 4 }
 0x309   :  { %v1092_v6 = vrot.slane %v1091_v59, 2  ;;  %v1176_v7 = vrot.slane %v1175_v60, 2  ;;  %v1190_v32 = vrot.slane %v1189_v62, 2  ;;  %v1285_v37 = vmin.f32 %v1262_v8, %v1263_v10 }
 0x30a   :  { %v973_v16 = vmax.f32 %v971_v56, %v972_v1  ;;  %v987_v9 = vmin.f32 %v985_v57, %v986_v2  ;;  %v1079_v41 = vmax.f32 %v1077_v58, %v1078_v5  ;;  %v1273_v20 = vmax.f32 %v1271_v22, %v1272_v4 }
 0x30b   :  { %vm1455_vm10 = vcmp.eq.s32.totalorder %v2145_v24, 1  ;;  %v1093_v35 = vmin.f32 %v1091_v59, %v1092_v6  ;;  %v1177_v31 = vmax.f32 %v1175_v60, %v1176_v7  ;;  %v1191_v42 = vmin.f32 %v1189_v62, %v1190_v32 }
 0x30c   :  { %v1286_v43 = vrot.slane %v1285_v37, 4  ;;  %v974_v25 = vrot.slane %v973_v16, 1  ;;  %v988_v44 = vrot.slane %v987_v9, 1  ;;  %v1080_v45 = vrot.slane %v1079_v41, 1 }
 0x30d   :  { %v1274_v33 = vrot.slane %v1273_v20, 2  ;;  %v1094_v47 = vrot.slane %v1093_v35, 1  ;;  %v1178_v48 = vrot.slane %v1177_v31, 1  ;;  %v1192_v49 = vrot.slane %v1191_v42, 1 }
 0x30e   :  { %v1287_v8 = vmin.f32 %v1285_v37, %v1286_v43  ;;  %v975_v51 = vmax.f32 %v973_v16, %v974_v25  ;;  %v989_v52 = vmin.f32 %v987_v9, %v988_v44  ;;  %v1081_v10 = vmax.f32 %v1079_v41, %v1080_v45 }
 0x30f   :  { %v1275_v53 = vmax.f32 %v1273_v20, %v1274_v33  ;;  %vm1061_vm11 = vcmp.eq.s32.totalorder %v2135_v17, 1  ;;  %v1095_v54 = vmin.f32 %v1093_v35, %v1094_v47  ;;  %v1179_v55 = vmax.f32 %v1177_v31, %v1178_v48 }
 0x310   :  { %v1193_v56 = vmin.f32 %v1191_v42, %v1192_v49  ;;  %v1288_v57 = vrot.slane %v1287_v8, 2  ;;  %v1005_v58 = vrot.slane %v975_v51, %v2184_v50  ;;  %v1030_v22 = vrot.slane %v989_v52, %v2184_v50 }
 0x311   :  { %v1111_v59 = vrot.slane %v1081_v10, %v2184_v50  ;;  %v1276_v60 = vrot.slane %v1275_v53, 1  ;;  %v1136_v62 = vrot.slane %v1095_v54, %v2184_v50  ;;  %v1209_v1 = vrot.slane %v1179_v55, %v2184_v50 }
 0x312   :  { %v1234_v2 = vrot.slane %v1193_v56, %v2184_v50  ;;  %v1289_v5 = vmin.f32 %v1287_v8, %v1288_v57  ;;  %v2276_v4 = vrot.slane %v1005_v58, 7  ;;  %v2278_v6 = vrot.slane %v1030_v22, 7 }
 0x313   :  { %v2280_v7 = vrot.slane %v1111_v59, 7  ;;  %v1277_v32 = vmax.f32 %v1275_v53, %v1276_v60  ;;  %v2282_v37 = vrot.slane %v1136_v62, 7  ;;  %v2284_v16 = vrot.slane %v1209_v1, 7 }
 0x314   :  { %v2286_v9 = vrot.slane %v1234_v2, 7  ;;  %v1290_v41 = vrot.slane %v1289_v5, 1  ;;  %v1361_v35 = vsel %vm1357_vm9, %v2236_v39, 0.0  ;;  %v1459_v31 = vsel %vm1455_vm10, %v2236_v39, 0.0 }
 0x315   :  { %v1307_v20 = vrot.slane %v1277_v32, %v2184_v50  ;;  %v959_v42 = vsel %vm947_vm8, %v2241_v19, 0.0  ;;  %v1369_v25 = vmax.f32 %v2207_v11, %v1361_v35  ;;  %v1383_v44 = vmin.f32 %v2207_v11, %v1361_v35 }
 0x316   :  { %v1291_v43 = vmin.f32 %v1289_v5, %v1290_v41  ;;  %v1467_v45 = vmax.f32 %v2211_v34, %v1459_v31  ;;  %v1481_v15 = vmin.f32 %v2211_v34, %v1459_v31  ;;  %v962_v47 = vmax.f32 %v2215_v30, %v959_v42 }
 0x317   :  { %v2301_v33 = vrot.slane %v1307_v20, 7  ;;  %v976_v24 = vmin.f32 %v2215_v30, %v959_v42  ;;  %v1370_v48 = vrot.slane %v1369_v25, 4  ;;  %v1384_v36 = vrot.slane %v1383_v44, 4 }
 0x318   :  { %v1332_v39 = vrot.slane %v1291_v43, %v2184_v50  ;;  %v1468_v49 = vrot.slane %v1467_v45, 4  ;;  %v1482_v8 = vrot.slane %v1481_v15, 4  ;;  %v963_v51 = vrot.slane %v962_v47, 4  ;;  %v2310_v10 = vpop.f32.mrb[8].mxu0 }
 0x319   :  { %v977_v52 = vrot.slane %v976_v24, 4  ;;  %v1065_v11 = vsel %vm1061_vm11, %v2241_v19, 0.0  ;;  %v1371_v34 = vmax.f32 %v1369_v25, %v1370_v48  ;;  %v1385_v54 = vmin.f32 %v1383_v44, %v1384_v36  ;;  %v2314_v30 = vpop.f32.mrb[9].mxu0 }
 0x31a   :  { %v2312_v53 = vrot.slane %v1332_v39, 7  ;;  %v1469_v55 = vmax.f32 %v1467_v45, %v1468_v49  ;;  %v1483_v56 = vmin.f32 %v1481_v15, %v1482_v8  ;;  %v964_v57 = vmax.f32 %v962_v47, %v963_v51  ;;  %v2317_v59 = vpop.f32.mrb[10].mxu0 }
 0x31b   :  { %v978_v58 = vmin.f32 %v976_v24, %v977_v52  ;;  %v1068_v22 = vmax.f32 %v2219_v27, %v1065_v11  ;;  %v1372_v60 = vrot.slane %v1371_v34, 2  ;;  %v1386_v62 = vrot.slane %v1385_v54, 2  ;;  %v2320_v2 = vpop.f32.mrb[11].mxu0 }
 0x31c   :  { %v1470_v17 = vrot.slane %v1469_v55, 2  ;;  %vm907_vm12 = vcmask 1041409   ;;  %v1082_v1 = vmin.f32 %v2219_v27, %v1065_v11  ;;  %v1484_v5 = vrot.slane %v1483_v56, 2 }
 0x31d   :  { %vm909_vm13 = vcmask 1043459   ;;  %v965_v32 = vrot.slane %v964_v57, 2  ;;  %v979_v41 = vrot.slane %v978_v58, 2  ;;  %v1069_v20 = vrot.slane %v1068_v22, 4 }
 0x31e   :  { %v1373_v35 = vmax.f32 %v1371_v34, %v1372_v60  ;;  %v1387_v31 = vmin.f32 %v1385_v54, %v1386_v62  ;;  %v1471_v42 = vmax.f32 %v1469_v55, %v1470_v17  ;;  %vm911_vm14 = vcmask 1045509   ;;  %v1445_v62 = vpop.permute.xlu0 %1444 }
 0x31f   :  { %v1083_v43 = vrot.slane %v1082_v1, 4  ;;  %vm1159_vm15 = vcmp.eq.s32.totalorder %v2137_v18, 1  ;;  %v1485_v25 = vmin.f32 %v1483_v56, %v1484_v5  ;;  %vm913_vm0 = vcmask 1047559  }
 0x320   :  { %v966_v44 = vmax.f32 %v964_v57, %v965_v32  ;;  %v980_v45 = vmin.f32 %v978_v58, %v979_v41  ;;  %v1070_v15 = vmax.f32 %v1068_v22, %v1069_v20  ;;  %v1374_v27 = vrot.slane %v1373_v35, 1  ;;  %v2323_v51 = vpop.f32.mrb[12].mxu0 }
 0x321   :  { %v1388_v47 = vrot.slane %v1387_v31, 1  ;;  %v1472_v24 = vrot.slane %v1471_v42, 1  ;;  %v1084_v39 = vmin.f32 %v1082_v1, %v1083_v43  ;;  %v1486_v48 = vrot.slane %v1485_v25, 1  ;;  %v2327_v55 = vpop.f32.mrb[13].mxu0 }
 0x322   :  { %v967_v36 = vrot.slane %v966_v44, 1  ;;  %v981_v49 = vrot.slane %v980_v45, 1  ;;  %v1071_v8 = vrot.slane %v1070_v15, 2  ;;  %vm1257_vm1 = vcmp.eq.s32.totalorder %v2147_v26, 1  ;;  %v2329_v60 = vpop.f32.mrb[14].mxu0 }
 0x323   :  { %vm1355_vm2 = vcmp.eq.s32.totalorder %v2149_v28, 1  ;;  %v1375_v52 = vmax.f32 %v1373_v35, %v1374_v27  ;;  %v1389_v11 = vmin.f32 %v1387_v31, %v1388_v47  ;;  %v1473_v34 = vmax.f32 %v1471_v42, %v1472_v24  ;;  %v2334_v41 = vpop.f32.mrb[15].mxu0 }
 0x324   :  { %v1085_v54 = vrot.slane %v1084_v39, 2  ;;  %v1487_v56 = vmin.f32 %v1485_v25, %v1486_v48  ;;  %v968_v57 = vmax.f32 %v966_v44, %v967_v36  ;;  %v982_v58 = vmin.f32 %v980_v45, %v981_v49 }
 0x325   :  { %v1072_v22 = vmax.f32 %v1070_v15, %v1071_v8  ;;  %v1405_v17 = vrot.slane %v1375_v52, %v2184_v50  ;;  %v1430_v1 = vrot.slane %v1389_v11, %v2184_v50  ;;  %v1503_v5 = vrot.slane %v1473_v34, %v2184_v50 }
 0x326   :  { %v1086_v32 = vmin.f32 %v1084_v39, %v1085_v54  ;;  %v1528_v20 = vrot.slane %v1487_v56, %v2184_v50  ;;  %v998_v35 = vrot.slane %v968_v57, %v2184_v50  ;;  %v1023_v31 = vrot.slane %v982_v58, %v2184_v50 }
 0x327   :  { %v1073_v42 = vrot.slane %v1072_v22, 1  ;;  %v2339_v43 = vrot.slane %v1405_v17, 7  ;;  %v2341_v25 = vrot.slane %v1430_v1, 7  ;;  %v2343_v44 = vrot.slane %v1503_v5, 7 }
 0x328   :  { %v1087_v45 = vrot.slane %v1086_v32, 1  ;;  %vm1453_vm3 = vcmp.eq.s32.totalorder %v1445_v62, 1  ;;  %v2345_v15 = vrot.slane %v1528_v20, 7  ;;  %v1009_v27 = vsel %vm907_vm12, %v2276_v4, %v998_v35 }
 0x329   :  { %v1034_v47 = vsel %vm907_vm12, %v2278_v6, %v1023_v31  ;;  %v1074_v24 = vmax.f32 %v1072_v22, %v1073_v42  ;;  %v1010_v39 = vsel %vm909_vm13, %v2276_v4, %v1009_v27  ;;  %v1163_v49 = vsel %vm1159_vm15, %v2241_v19, 0.0 }
 0x32a   :  { %v1035_v48 = vsel %vm909_vm13, %v2278_v6, %v1034_v47  ;;  %v1088_v36 = vmin.f32 %v1086_v32, %v1087_v45  ;;  %v1011_v8 = vsel %vm911_vm14, %v2276_v4, %v1010_v39  ;;  %v1166_v34 = vmax.f32 %v2223_v13, %v1163_v49 }
 0x32b   :  { %v1036_v52 = vsel %vm911_vm14, %v2278_v6, %v1035_v48  ;;  %v1104_v11 = vrot.slane %v1074_v24, %v2184_v50  ;;  %v1012_v54 = vsel %vm913_vm0, %v2276_v4, %v1011_v8  ;;  %v1180_v18 = vmin.f32 %v2223_v13, %v1163_v49 }
 0x32c   :  { %v1037_v56 = vsel %vm913_vm0, %v2278_v6, %v1036_v52  ;;  %v1129_v57 = vrot.slane %v1088_v36, %v2184_v50  ;;  %1014 = vst [vmem:[#allocation11] sm:$0x3] %v1012_v54  ;;  %v1167_v22 = vrot.slane %v1166_v34, 4  ;;  %v1261_v17 = vsel %vm1257_vm1, %v2241_v19, 0.0 }
 0x32d   :  { %1039 = vst [vmem:[#allocation11 + $0xc] sm:$0x3] %v1037_v56  ;;  %v1115_v58 = vsel %vm907_vm12, %v2280_v7, %v1104_v11  ;;  %v1359_v4 = vsel %vm1355_vm2, %v2241_v19, 0.0  ;;  %v1181_v1 = vrot.slane %v1180_v18, 4  ;;  %v1264_v5 = vmax.f32 %v2227_v14, %v1261_v17 }
 0x32e   :  { %v1116_v6 = vsel %vm909_vm13, %v2280_v7, %v1115_v58  ;;  %v1140_v13 = vsel %vm907_vm12, %v2282_v37, %v1129_v57  ;;  %v1168_v20 = vmax.f32 %v1166_v34, %v1167_v22  ;;  %v1278_v35 = vmin.f32 %v2227_v14, %v1261_v17 }
 0x32f   :  { %v1117_v32 = vsel %vm911_vm14, %v2280_v7, %v1116_v6  ;;  %v1141_v26 = vsel %vm909_vm13, %v2282_v37, %v1140_v13  ;;  %v1182_v42 = vmin.f32 %v1180_v18, %v1181_v1  ;;  %v1265_v45 = vrot.slane %v1264_v5, 4 }
 0x330   :  { %v1118_v28 = vsel %vm913_vm0, %v2280_v7, %v1117_v32  ;;  %v1142_v31 = vsel %vm911_vm14, %v2282_v37, %v1141_v26  ;;  %v1169_v47 = vrot.slane %v1168_v20, 2  ;;  %v1279_v24 = vrot.slane %v1278_v35, 4 }
 0x331   :  { %1120 = vst [vmem:[#allocation11 + $0x2] sm:$0x3] %v1118_v28  ;;  %v1143_v27 = vsel %vm913_vm0, %v2282_v37, %v1142_v31  ;;  %v1362_v39 = vmax.f32 %v2231_v38, %v1359_v4  ;;  %v1183_v48 = vrot.slane %v1182_v42, 2  ;;  %v1266_v36 = vmax.f32 %v1264_v5, %v1265_v45 }
 0x332   :  { %1145 = vst [vmem:[#allocation11 + $0xe] sm:$0x3] %v1143_v27  ;;  %v1376_v14 = vmin.f32 %v2231_v38, %v1359_v4  ;;  %v1457_v7 = vsel %vm1453_vm3, %v2241_v19, 0.0  ;;  %v1170_v49 = vmax.f32 %v1168_v20, %v1169_v47  ;;  %v1280_v8 = vmin.f32 %v1278_v35, %v1279_v24 }
 0x333   :  { %v1363_v52 = vrot.slane %v1362_v39, 4  ;;  %v1460_v11 = vmax.f32 %v2234_v29, %v1457_v7  ;;  %v1184_v34 = vmin.f32 %v1182_v42, %v1183_v48  ;;  %v1267_v54 = vrot.slane %v1266_v36, 2 }
 0x334   :  { %v1377_v37 = vrot.slane %v1376_v14, 4  ;;  %v1474_v56 = vmin.f32 %v2234_v29, %v1457_v7  ;;  %v1171_v57 = vrot.slane %v1170_v49, 1  ;;  %v1281_v18 = vrot.slane %v1280_v8, 2 }
 0x335   :  { %v1364_v58 = vmax.f32 %v1362_v39, %v1363_v52  ;;  %v1461_v22 = vrot.slane %v1460_v11, 4  ;;  %v1185_v17 = vrot.slane %v1184_v34, 1  ;;  %v1268_v6 = vmax.f32 %v1266_v36, %v1267_v54 }
 0x336   :  { %v1378_v38 = vmin.f32 %v1376_v14, %v1377_v37  ;;  %v1475_v4 = vrot.slane %v1474_v56, 4  ;;  %v1172_v62 = vmax.f32 %v1170_v49, %v1171_v57  ;;  %v1282_v19 = vmin.f32 %v1280_v8, %v1281_v18 }
 0x337   :  { %v1365_v13 = vrot.slane %v1364_v58, 2  ;;  %v1462_v1 = vmax.f32 %v1460_v11, %v1461_v22  ;;  %v1186_v5 = vmin.f32 %v1184_v34, %v1185_v17  ;;  %v1269_v32 = vrot.slane %v1268_v6, 1 }
 0x338   :  { %v1379_v26 = vrot.slane %v1378_v38, 2  ;;  %v1476_v20 = vmin.f32 %v1474_v56, %v1475_v4  ;;  %v1202_v35 = vrot.slane %v1172_v62, %v2184_v50  ;;  %v1283_v28 = vrot.slane %v1282_v19, 1 }
 0x339   :  { %v1366_v29 = vmax.f32 %v1364_v58, %v1365_v13  ;;  %v1463_v31 = vrot.slane %v1462_v1, 2  ;;  %v1227_v42 = vrot.slane %v1186_v5, %v2184_v50  ;;  %v1270_v45 = vmax.f32 %v1268_v6, %v1269_v32 }
 0x33a   :  { %v1380_v27 = vmin.f32 %v1378_v38, %v1379_v26  ;;  %v1477_v47 = vrot.slane %v1476_v20, 2  ;;  %v1213_v24 = vsel %vm907_vm12, %v2284_v16, %v1202_v35  ;;  %v1284_v39 = vmin.f32 %v1282_v19, %v1283_v28 }
 0x33b   :  { %v1367_v48 = vrot.slane %v1366_v29, 1  ;;  %v1464_v36 = vmax.f32 %v1462_v1, %v1463_v31  ;;  %v1214_v14 = vsel %vm909_vm13, %v2284_v16, %v1213_v24  ;;  %v1238_v7 = vsel %vm907_vm12, %v2286_v9, %v1227_v42 }
 0x33c   :  { %v1300_v49 = vrot.slane %v1270_v45, %v2184_v50  ;;  %v1381_v8 = vrot.slane %v1380_v27, 1  ;;  %v1215_v52 = vsel %vm911_vm14, %v2284_v16, %v1214_v14  ;;  %v1239_v11 = vsel %vm909_vm13, %v2286_v9, %v1238_v7 }
 0x33d   :  { %v1325_v34 = vrot.slane %v1284_v39, %v2184_v50  ;;  %v1368_v54 = vmax.f32 %v1366_v29, %v1367_v48  ;;  %v1216_v37 = vsel %vm913_vm0, %v2284_v16, %v1215_v52  ;;  %v1240_v56 = vsel %vm911_vm14, %v2286_v9, %v1239_v11 }
 0x33e   :  { %v1311_v57 = vsel %vm907_vm12, %v2301_v33, %v1300_v49  ;;  %v1382_v18 = vmin.f32 %v1380_v27, %v1381_v8  ;;  %1218 = vst [vmem:[#allocation11 + $0x4] sm:$0x3] %v1216_v37  ;;  %v1241_v58 = vsel %vm913_vm0, %v2286_v9, %v1240_v56  ;;  %v1465_v62 = vrot.slane %v1464_v36, 1 }
 0x33f   :  { %v1312_v22 = vsel %vm909_vm13, %v2301_v33, %v1311_v57  ;;  %v1336_v17 = vsel %vm907_vm12, %v2312_v53, %v1325_v34  ;;  %v1398_v6 = vrot.slane %v1368_v54, %v2184_v50  ;;  %1243 = vst [vmem:[#allocation11 + $0x10] sm:$0x3] %v1241_v58  ;;  %v1478_v1 = vmin.f32 %v1476_v20, %v1477_v47 }
 0x340   :  { %v1313_v16 = vsel %vm911_vm14, %v2301_v33, %v1312_v22  ;;  %v1337_v38 = vsel %vm909_vm13, %v2312_v53, %v1336_v17  ;;  %v1423_v4 = vrot.slane %v1382_v18, %v2184_v50  ;;  %v1466_v35 = vmax.f32 %v1464_v36, %v1465_v62 }
 0x341   :  { %v1314_v9 = vsel %vm913_vm0, %v2301_v33, %v1313_v16  ;;  %v1338_v19 = vsel %vm911_vm14, %v2312_v53, %v1337_v38  ;;  %v1409_v13 = vsel %vm907_vm12, %v2339_v43, %v1398_v6  ;;  %v1479_v29 = vrot.slane %v1478_v1, 1 }
 0x342   :  { %1316 = vst [vmem:[#allocation11 + $0x6] sm:$0x3] %v1314_v9  ;;  %v1339_v5 = vsel %vm913_vm0, %v2312_v53, %v1338_v19  ;;  %v1410_v32 = vsel %vm909_vm13, %v2339_v43, %v1409_v13  ;;  %v1434_v26 = vsel %vm907_vm12, %v2341_v25, %v1423_v4  ;;  %v832_v20 = vmax.f32 %v2196_v0, %v2244_v21 }
 0x343   :  { %1341 = vst [vmem:[#allocation11 + $0x12] sm:$0x3] %v1339_v5  ;;  %v1411_v33 = vsel %vm911_vm14, %v2339_v43, %v1410_v32  ;;  %v1435_v28 = vsel %vm909_vm13, %v2341_v25, %v1434_v26  ;;  %v1496_v42 = vrot.slane %v1466_v35, %v2184_v50  ;;  %v839_v45 = vmax.f32 %v2239_v40, %v2264_v63 }
 0x344   :  { %v1412_v53 = vsel %vm913_vm0, %v2339_v43, %v1411_v33  ;;  %v1436_v31 = vsel %vm911_vm14, %v2341_v25, %v1435_v28  ;;  %v1480_v47 = vmin.f32 %v1478_v1, %v1479_v29  ;;  %v833_v24 = vrot.slane %v832_v20, 4 }
 0x345   :  { %1414 = vst [vmem:[#allocation11 + $0x8] sm:$0x3] %v1412_v53  ;;  %v1437_v27 = vsel %vm913_vm0, %v2341_v25, %v1436_v31  ;;  %v786_v0 = vadd.f32 %v2310_v10, %v2190_v61  ;;  %v1507_v21 = vsel %vm907_vm12, %v2343_v44, %v1496_v42  ;;  %v840_v43 = vrot.slane %v839_v45, 4 }
 0x346   :  { %1439 = vst [vmem:[#allocation11 + $0x14] sm:$0x3] %v1437_v27  ;;  %v788_v39 = vadd.f32 %v2314_v30, %v2198_v3  ;;  %v790_v40 = vadd.f32 %v2317_v59, %v2190_v61  ;;  %v1508_v63 = vsel %vm909_vm13, %v2343_v44, %v1507_v21  ;;  %v1521_v25 = vrot.slane %v1480_v47, %v2184_v50 }
 0x347   :  { %v834_v48 = vmax.f32 %v832_v20, %v833_v24  ;;  %v792_v10 = vadd.f32 %v2320_v2, %v2198_v3  ;;  %v1509_v36 = vsel %vm911_vm14, %v2343_v44, %v1508_v63  ;;  %v841_v14 = vmax.f32 %v839_v45, %v840_v43 }
 0x348   :  { %v818_v7 = vmax.f32 %v786_v0, %v790_v40  ;;  %v796_v30 = vadd.f32 %v2323_v51, %v2190_v61  ;;  %v1510_v59 = vsel %vm913_vm0, %v2343_v44, %v1509_v36  ;;  %v1532_v49 = vsel %vm907_vm12, %v2345_v15, %v1521_v25 }
 0x349   :  { %v835_v8 = vrot.slane %v834_v48, 2  ;;  %v825_v52 = vmax.f32 %v788_v39, %v792_v10  ;;  %1512 = vst [vmem:[#allocation11 + $0xa] sm:$0x3] %v1510_v59  ;;  %v1533_v2 = vsel %vm909_vm13, %v2345_v15, %v1532_v49  ;;  %v842_v11 = vrot.slane %v841_v14, 2 }
 0x34a   :  { %v819_v34 = vrot.slane %v818_v7, 4  ;;  %v798_v54 = vadd.f32 %v2327_v55, %v2198_v3  ;;  %v1534_v51 = vsel %vm911_vm14, %v2345_v15, %v1533_v2  ;;  %v800_v44 = vadd.f32 %v2329_v60, %v2190_v61 }
 0x34b   :  { %v836_v37 = vmax.f32 %v834_v48, %v835_v8  ;;  %v826_v56 = vrot.slane %v825_v52, 4  ;;  %v1535_v57 = vsel %vm913_vm0, %v2345_v15, %v1534_v51  ;;  %v843_v18 = vmax.f32 %v841_v14, %v842_v11 }
 0x34c   :  { %v820_v58 = vmax.f32 %v818_v7, %v819_v34  ;;  %v802_v22 = vadd.f32 %v2334_v41, %v2198_v3  ;;  %1537 = vst [vmem:[#allocation11 + $0x16] sm:$0x3] %v1535_v57  ;;  %v846_v55 = vmax.f32 %v796_v30, %v800_v44  ;;  %v876_v45 = vrot.slane %v868_v12, %v2184_v50 }
 0x34d   :  { %v837_v17 = vrot.slane %v836_v37, 1  ;;  %v827_v6 = vmax.f32 %v825_v52, %v826_v56  ;;  %v844_v16 = vrot.slane %v843_v18, 1 }
 0x34e   :  { %v821_v38 = vrot.slane %v820_v58, 2  ;;  %v853_v4 = vmax.f32 %v798_v54, %v802_v22  ;;  %v847_v19 = vrot.slane %v846_v55, 4 }
 0x34f   :  { %v838_v62 = vmax.f32 %v836_v37, %v837_v17  ;;  %v828_v9 = vrot.slane %v827_v6, 2  ;;  %v845_v13 = vmax.f32 %v843_v18, %v844_v16 }
 0x350   :  { %v822_v61 = vmax.f32 %v820_v58, %v821_v38  ;;  %v854_v60 = vrot.slane %v853_v4, 4  ;;  %v848_v15 = vmax.f32 %v846_v55, %v847_v19 }
 0x351   :  { %v829_v1 = vmax.f32 %v827_v6, %v828_v9  ;;  %v885_v5 = vcombine.low %v838_v62, %v845_v13 }
 0x352   :  { %v823_v32 = vrot.slane %v822_v61, 1  ;;  %v855_v26 = vmax.f32 %v853_v4, %v854_v60  ;;  %v849_v3 = vrot.slane %v848_v15, 2 }
 0x353   :  { %v830_v35 = vrot.slane %v829_v1, 1  ;;  %v893_v43 = vrot.slane %v885_v5, %v2184_v50 }
 0x354   :  { %v824_v41 = vmax.f32 %v822_v61, %v823_v32  ;;  %v856_v33 = vrot.slane %v855_v26, 2  ;;  %v850_v29 = vmax.f32 %v848_v15, %v849_v3 }
 0x355   :  { %v831_v28 = vmax.f32 %v829_v1, %v830_v35 }
 0x356   :  { %v857_v20 = vmax.f32 %v855_v26, %v856_v33  ;;  %v851_v31 = vrot.slane %v850_v29, 1 }
 0x357   :  { %v869_v53 = vcombine.low %v824_v41, %v831_v28 }
 0x358   :  { %v858_v42 = vrot.slane %v857_v20, 1  ;;  %v852_v47 = vmax.f32 %v850_v29, %v851_v31 }
 0x359   :  { %v883_v27 = vrot.slane %v869_v53, %v2184_v50 }
 0x35a   :  { %v859_v24 = vmax.f32 %v857_v20, %v858_v42 }
 0x35b   :  { %v884_v0 = vcombine.low %v876_v45, %v883_v27 }
 0x35c   :  { %v886_v21 = vcombine.low %v852_v47, %v859_v24 }
 0x35e   :  { %v900_v39 = vrot.slane %v886_v21, %v2184_v50 }
 0x360   :  { %v901_v40 = vcombine.low %v893_v43, %v900_v39 }
 0x362   :  { %v906_v63 = vrot.slane %v901_v40, 7 }
 0x364   :  { %v908_v25 = vsel %vm907_vm12, %v906_v63, %v884_v0 }
 0x365   :  { %v910_v48 = vsel %vm909_vm13, %v906_v63, %v908_v25 }
 0x366   :  { %v912_v23 = vsel %vm911_vm14, %v906_v63, %v910_v48 }
 0x367   :  { %v914_v46 = vsel %vm913_vm0, %v906_v63, %v912_v23 }
 0x368   :  { %916 = vst [vmem:[#allocation11 + $0x18] sm:$0xff] %v914_v46 }
 0x369   :  { %1892 = shalt.err (!%p1889_p2)
}
 0x36a   :  { %s1893_s15 = scalar_lea.hbm %s2524_s9, 512 }
 0x36b   :  { %p1894_p3 = scmp.ne.s32.totalorder %s2524_s9, %s1893_s15  ;;  %p1897_p4 = scmp.lt.u32.totalorder %s1893_s15, %s2524_s9 }
 0x36d   :  { %p1899_p5 = pnand %p1897_p4, %p1894_p3 }
 0x36f   :  { %1902 = shalt.err (!%p1899_p5)
}
 0x370   :  { %1547 = dma.vmem_to_hbm [thread:$0]  %s1545_s13, 512, %s2524_s9, [#allocation4]  }
 0x371   :  { %1909 = dma.done.wait [#allocation4], 512  }
 0x372   :  { %1910 = vsyncadd [#allocation4], 4294966784 }
 0x373   :  { %1551 = vsyncpa [#allocation3], 1 }
 0x374   :  { %1552 = vsyncpa [#allocation6], 1 }
 0x375   :  { %1553 = vsyncpa [#allocation9], 1 }
 0x376   :  { %1554 = vsyncpa [#allocation4], 1 }

</bundles_post_ra>
